<compile_context>
chip_gen: v5e
topology: v5e:2x2
jax: 0.10.0
libtpu: 0.0.40
codegen_flags: <defaults>
</compile_context>

<pallas_src>
import math

import jax
import jax.numpy as jnp
import numpy as np
from jax.experimental import pallas as pl
from jax.experimental.pallas import tpu as pltpu


# ----------------------------------------------------------------------------
# Weight packing: one (R, 4H) f32 array, static row offsets
# ----------------------------------------------------------------------------
def _pack_weights(layer_params, w_fc, b_fc, d0p, H, out_dim):
    """Wide-state layout: the recurrent state h lives in lanes [2H, 3H) of a
    (B, 4H) vreg.  W_hh, W_ih (layers > 0) and W_fc are zero-padded so only
    rows [2H, 3H) are non-zero -> garbage lanes of the wide state multiply
    zero rows and never leak into valid results."""
    G = 4 * H
    blocks, layout = [], []
    row = 0
    for l, (w_ih, w_hh, b) in enumerate(layer_params):
        d_in = w_ih.shape[0]
        if l == 0:
            wih_rows = d0p
            blk = jnp.zeros((d0p, G), jnp.float32).at[:d_in, :].set(w_ih)
        else:
            wih_rows = G
            blk = jnp.zeros((G, G), jnp.float32).at[2 * H:3 * H, :].set(w_ih)
        wih_off = row
        blocks.append(blk)
        row += wih_rows

        whh_off = row
        blocks.append(jnp.zeros((G, G), jnp.float32).at[2 * H:3 * H, :].set(w_hh))
        row += G

        b_off = row
        blocks.append(jnp.zeros((8, G), jnp.float32).at[0, :].set(b.reshape(-1)))
        row += 8

        layout.append((wih_off, wih_rows, whh_off, b_off))

    fc_off = row
    blocks.append(
        jnp.zeros((G, G), jnp.float32).at[2 * H:3 * H, :out_dim].set(w_fc))
    row += G

    bfc_off = row
    blocks.append(
        jnp.zeros((8, G), jnp.float32).at[0, :out_dim].set(b_fc.reshape(-1)))
    row += 8

    return jnp.concatenate(blocks, axis=0), layout, fc_off, bfc_off


# ----------------------------------------------------------------------------
# Fused Pallas kernel: all LSTM layers + final FC in one call
# ----------------------------------------------------------------------------
def _make_kernel(layout, fc_off, bfc_off, num_layer, T, Bp, H):
    G = 4 * H  # == 128: one lane tile; (Bp, G) f32 == exactly one vreg

    def kernel(x_ref, mask_ref, w_ref, out_ref, xproj_sc, *maybe_seq):
        seq_sc = maybe_seq[0] if maybe_seq else None

        h = jnp.zeros((Bp, G), jnp.float32)  # overwritten per layer

        for l in range(num_layer):
            wih_off, wih_rows, whh_off, b_off = layout[l]
            w_ih = w_ref[pl.ds(wih_off, wih_rows), :]   # (D_in|G, G)
            w_hh = w_ref[pl.ds(whh_off, G), :]          # (G, G), rows 2H:3H live
            bias = w_ref[pl.ds(b_off, 1), :]            # (1, G)

            # ---- Hoisted input projection: one GEMM per layer --------------
            layer_in = x_ref[...] if l == 0 else seq_sc[...]
            xproj_sc[...] = (
                jnp.dot(layer_in, w_ih, preferred_element_type=jnp.float32)
                + bias)                                  # (T*Bp, G)

            # ---- Serial recurrence: h/c are register-resident (one vreg) ---
            h = jnp.zeros((Bp, G), jnp.float32)
            c = jnp.zeros((Bp, G), jnp.float32)
            write_seq = (l + 1) < num_layer  # last layer's sequence is dead

            for t in range(T):
                z = xproj_sc[pl.ds(t * Bp, Bp), :] + jnp.dot(
                    h, w_hh, preferred_element_type=jnp.float32)  # (Bp, G)

                # Full-vreg nonlinearities (EUP) + explicit lane rolls (XLU)
                # instead of per-gate 32-lane slices. Gate order [i|f|g|o];
                # state lives in the g-group lanes [2H, 3H).
                sig = jax.nn.sigmoid(z)
                th = jnp.tanh(z)
                i_al = pltpu.roll(sig, shift=2 * H, axis=1)  # i -> [2H,3H)
                f_al = pltpu.roll(sig, shift=1 * H, axis=1)  # f -> [2H,3H)
                o_al = pltpu.roll(sig, shift=3 * H, axis=1)  # o -> [2H,3H)

                c_new = f_al * c + i_al * th
                h_new = o_al * jnp.tanh(c_new)

                m = mask_ref[pl.ds(t * Bp, Bp), :]   # (Bp, G) f32, pre-broadcast
                keep = m != 0.0
                h = jnp.where(keep, h_new, h)        # freeze past length
                c = jnp.where(keep, c_new, c)
                if write_seq:
                    # Zero past each length (packed-sequence semantics).
                    seq_sc[pl.ds(t * Bp, Bp), :] = m * h_new

        # ---- Final nn.Linear(hidden, 2) on hn[-1] (lane-dense padded out) ---
        w_fc = w_ref[pl.ds(fc_off, G), :]    # (G, G), rows 2H:3H / cols :2 live
        b_fc = w_ref[pl.ds(bfc_off, 1), :]   # (1, G)
        out_ref[...] = (jnp.dot(h, w_fc, preferred_element_type=jnp.float32)
                        + b_fc)

    return kernel


# ----------------------------------------------------------------------------
# Wrapper
# ----------------------------------------------------------------------------
def lstm_forward(x, lengths, layer_params, w_fc, b_fc):
    """x: (B, T, input_size), batch_first=True; lengths: (B,) int."""
    B, T, D_in = x.shape
    H = w_fc.shape[0]
    out_dim = w_fc.shape[1]
    num_layer = len(layer_params)
    G = 4 * H
    assert G == 128, "wide-state kernel assumes 4*hidden_size == 128 lanes"

    Bp = ((B + 7) // 8) * 8          # pad batch to one sublane tile
    D0p = ((D_in + 7) // 8) * 8      # pad input features to sublane multiple

    # Time-major rows: row index = t*Bp + b, batch/features zero-padded.
    x_tbd = jnp.transpose(x, (1, 0, 2)).astype(jnp.float32)
    x_pad = jnp.zeros((T, Bp, D0p), jnp.float32).at[:, :B, :D_in].set(x_tbd)
    x2d = x_pad.reshape(T * Bp, D0p)

    # Mask pre-broadcast to 128 lanes; padded batch rows are always masked.
    mask_tb = (jnp.arange(T, dtype=jnp.int32)[:, None]
               < lengths.astype(jnp.int32)[None, :]).astype(jnp.float32)
    mask_pad = jnp.zeros((T, Bp), jnp.float32).at[:, :B].set(mask_tb)
    mask2d = jnp.broadcast_to(mask_pad[:, :, None], (T, Bp, G)).reshape(T * Bp, G)

    w_packed, layout, fc_off, bfc_off = _pack_weights(
        layer_params, w_fc, b_fc, D0p, H, out_dim)

    vmem = pl.BlockSpec(memory_space=pltpu.MemorySpace.VMEM)
    scratch = [pltpu.VMEM((T * Bp, G), jnp.float32)]        # hoisted projection
    if num_layer > 1:
        scratch.append(pltpu.VMEM((T * Bp, G), jnp.float32))  # inter-layer seq

    kernel = _make_kernel(layout, fc_off, bfc_off, num_layer, T, Bp, H)
    out_wide = pl.pallas_call(
        kernel,
        out_shape=jax.ShapeDtypeStruct((Bp, G), jnp.float32),
        in_specs=[vmem, vmem, vmem],
        out_specs=vmem,
        scratch_shapes=scratch,
    )(x2d, mask2d, w_packed)
    return out_wide[:B, :out_dim]


# ----------------------------------------------------------------------------
# Pure-JAX reference (same semantics) for a correctness check
# ----------------------------------------------------------------------------
def reference_forward(x, lengths, layer_params, w_fc, b_fc):
    B, T, _ = x.shape
    seq = x.astype(jnp.float32)
    h_last = None
    for (w_ih, w_hh, b) in layer_params:
        H = w_hh.shape[0]
        h = jnp.zeros((B, H), jnp.float32)
        c = jnp.zeros((B, H), jnp.float32)
        outs = []
        for t in range(T):
            xt = seq[:, t, :]
            z = xt @ w_ih + h @ w_hh + b
            i_g = jax.nn.sigmoid(z[:, 0 * H:1 * H])
            f_g = jax.nn.sigmoid(z[:, 1 * H:2 * H])
            g_g = jnp.tanh(z[:, 2 * H:3 * H])
            o_g = jax.nn.sigmoid(z[:, 3 * H:4 * H])
            c_new = f_g * c + i_g * g_g
            h_new = o_g * jnp.tanh(c_new)
            m = (t < lengths).astype(jnp.float32)[:, None]
            h = m * h_new + (1.0 - m) * h
            c = m * c_new + (1.0 - m) * c
            outs.append(m * h_new)
        seq = jnp.stack(outs, axis=1)
        h_last = h
    return h_last @ w_fc + b_fc


# ----------------------------------------------------------------------------
# Deterministic parameter init (fused-gate layout, shapes follow nn.LSTM/Linear)
# ----------------------------------------------------------------------------
def init_params(key, input_size, hidden_size, num_layer, output_size=2):
    k = 1.0 / math.sqrt(hidden_size)
    layer_params = []
    for l in range(num_layer):
        d_in = input_size if l == 0 else hidden_size
        key, k1, k2, k3, k4 = jax.random.split(key, 5)
        # Fused gate layout along the last axis: [ i | f | g | o ] (PyTorch order).
        w_ih = jax.random.uniform(k1, (d_in, 4 * hidden_size), jnp.float32, -k, k)
        w_hh = jax.random.uniform(k2, (hidden_size, 4 * hidden_size), jnp.float32, -k, k)
        b_ih = jax.random.uniform(k3, (1, 4 * hidden_size), jnp.float32, -k, k)
        b_hh = jax.random.uniform(k4, (1, 4 * hidden_size), jnp.float32, -k, k)
        layer_params.append((w_ih, w_hh, b_ih + b_hh))
    key, kf1, kf2 = jax.random.split(key, 3)
    w_fc = jax.random.uniform(kf1, (hidden_size, output_size), jnp.float32, -k, k)
    b_fc = jax.random.uniform(kf2, (1, output_size), jnp.float32, -k, k)
    return layer_params, w_fc, b_fc


if __name__ == "__main__":
    # Small shapes consistent with the module's forward():
    #   x: (batch=2, seq=8, input_size=32), hidden_size=32, num_layer=2, out=2
    B, T, INPUT_SIZE, HIDDEN_SIZE, NUM_LAYER = 2, 8, 32, 32, 2

    key = jax.random.PRNGKey(0)
    key, kx = jax.random.split(key)
    x = jax.random.normal(kx, (B, T, INPUT_SIZE), dtype=jnp.float32)
    # pack_padded_sequence convention: lengths sorted descending
    lengths = jnp.array([8, 5], dtype=jnp.int32)

    layer_params, w_fc, b_fc = init_params(key, INPUT_SIZE, HIDDEN_SIZE, NUM_LAYER)

    out = lstm_forward(x, lengths, layer_params, w_fc, b_fc)
    out = jax.block_until_ready(out)

    ref = reference_forward(x, lengths, layer_params, w_fc, b_fc)
    np.testing.assert_allclose(np.asarray(out), np.asarray(ref),
                               rtol=2e-3, atol=2e-3)

    print("KERNEL_OK")
</pallas_src>

<mosaic_0001>
module attributes {stable_mosaic.version = 11 : i64} {
  func.func @kernel(%arg0: memref<64x32xf32, #tpu.memory_space<vmem>>, %arg1: memref<64x128xf32, #tpu.memory_space<vmem>>, %arg2: memref<568x128xf32, #tpu.memory_space<vmem>>, %arg3: memref<8x128xf32, #tpu.memory_space<vmem>>, %arg4: memref<64x128xf32, #tpu.memory_space<vmem>>, %arg5: memref<64x128xf32, #tpu.memory_space<vmem>>) attributes {dimension_semantics = [], scalar_prefetch = 0 : i64, scratch_operands = 2 : i64, tpu.core_type = #tpu.core_type<tc>} {
    %c0 = arith.constant 0 : index
    %c0_0 = arith.constant 0 : index
    %0 = vector.load %arg2[%c0, %c0_0] : memref<568x128xf32, #tpu.memory_space<vmem>>, vector<32x128xf32>
    %c32 = arith.constant 32 : index
    %c0_1 = arith.constant 0 : index
    %1 = vector.load %arg2[%c32, %c0_1] : memref<568x128xf32, #tpu.memory_space<vmem>>, vector<128x128xf32>
    %c160 = arith.constant 160 : index
    %c0_2 = arith.constant 0 : index
    %2 = vector.load %arg2[%c160, %c0_2] : memref<568x128xf32, #tpu.memory_space<vmem>>, vector<1x128xf32>
    %c0_3 = arith.constant 0 : index
    %c0_4 = arith.constant 0 : index
    %3 = vector.load %arg0[%c0_3, %c0_4] : memref<64x32xf32, #tpu.memory_space<vmem>>, vector<64x32xf32>
    %cst = arith.constant dense<0.000000e+00> : vector<64x128xf32>
    %4 = tpu.matmul %3, %0, %cst {dimension_numbers = #tpu.dot_dimension_numbers<[1], [0], [0], [1], [0, 0, 1, 1], [], []>} : vector<64x32xf32>, vector<32x128xf32>, vector<64x128xf32> -> vector<64x128xf32>
    %5 = vector.broadcast %2 : vector<1x128xf32> to vector<64x128xf32>
    %6 = arith.addf %4, %5 : vector<64x128xf32>
    %c0_5 = arith.constant 0 : index
    %c0_6 = arith.constant 0 : index
    %7 = vector.load %arg4[%c0_5, %c0_6] : memref<64x128xf32, #tpu.memory_space<vmem>>, vector<64x128xf32>
    tpu.vector_store %arg4[%c0_5, %c0_6], %6 {strides = array<i32>} : memref<64x128xf32, #tpu.memory_space<vmem>>, vector<64x128xf32>,
    %cst_7 = arith.constant 0.000000e+00 : f32
    %8 = vector.broadcast %cst_7 : f32 to vector<8x128xf32>
    %cst_8 = arith.constant 0.000000e+00 : f32
    %9 = vector.broadcast %cst_8 : f32 to vector<8x128xf32>
    %c0_9 = arith.constant 0 : index
    %c0_10 = arith.constant 0 : index
    %10 = vector.load %arg4[%c0_9, %c0_10] : memref<64x128xf32, #tpu.memory_space<vmem>>, vector<8x128xf32>
    %cst_11 = arith.constant dense<0.000000e+00> : vector<8x128xf32>
    %11 = tpu.matmul %8, %1, %cst_11 {dimension_numbers = #tpu.dot_dimension_numbers<[1], [0], [0], [1], [0, 0, 1, 1], [], []>} : vector<8x128xf32>, vector<128x128xf32>, vector<8x128xf32> -> vector<8x128xf32>
    %12 = arith.addf %10, %11 : vector<8x128xf32>
    %13 = arith.negf %12 : vector<8x128xf32>
    %14 = math.exp %13 : vector<8x128xf32>
    %cst_12 = arith.constant 1.000000e+00 : f32
    %15 = vector.broadcast %cst_12 : f32 to vector<8x128xf32>
    %16 = arith.addf %15, %14 : vector<8x128xf32>
    %17 = arith.divf %15, %16 : vector<8x128xf32>
    %18 = math.tanh %12 : vector<8x128xf32>
    %c64_i32 = arith.constant 64 : i32
    %19 = tpu.dynamic_rotate %17 by %c64_i32 dim 1 : vector<8x128xf32>, i32 -> vector<8x128xf32>
    %c32_i32 = arith.constant 32 : i32
    %20 = tpu.dynamic_rotate %17 by %c32_i32 dim 1 : vector<8x128xf32>, i32 -> vector<8x128xf32>
    %c96_i32 = arith.constant 96 : i32
    %21 = tpu.dynamic_rotate %17 by %c96_i32 dim 1 : vector<8x128xf32>, i32 -> vector<8x128xf32>
    %22 = arith.mulf %20, %9 : vector<8x128xf32>
    %23 = arith.mulf %19, %18 : vector<8x128xf32>
    %24 = arith.addf %22, %23 : vector<8x128xf32>
    %25 = math.tanh %24 : vector<8x128xf32>
    %26 = arith.mulf %21, %25 : vector<8x128xf32>
    %c0_13 = arith.constant 0 : index
    %c0_14 = arith.constant 0 : index
    %27 = vector.load %arg1[%c0_13, %c0_14] : memref<64x128xf32, #tpu.memory_space<vmem>>, vector<8x128xf32>
    %cst_15 = arith.constant 0.000000e+00 : f32
    %28 = vector.broadcast %cst_15 : f32 to vector<8x128xf32>
    %29 = arith.cmpf one, %27, %28 : vector<8x128xf32>
    %30 = arith.select %29, %26, %8 : vector<8x128xi1>, vector<8x128xf32>
    %31 = arith.select %29, %24, %9 : vector<8x128xi1>, vector<8x128xf32>
    %32 = arith.mulf %27, %26 : vector<8x128xf32>
    %c0_16 = arith.constant 0 : index
    %c0_17 = arith.constant 0 : index
    %33 = vector.load %arg5[%c0_16, %c0_17] : memref<64x128xf32, #tpu.memory_space<vmem>>, vector<8x128xf32>
    tpu.vector_store %arg5[%c0_16, %c0_17], %32 {strides = array<i32>} : memref<64x128xf32, #tpu.memory_space<vmem>>, vector<8x128xf32>,
    %c8 = arith.constant 8 : index
    %c0_18 = arith.constant 0 : index
    %34 = vector.load %arg4[%c8, %c0_18] : memref<64x128xf32, #tpu.memory_space<vmem>>, vector<8x128xf32>
    %cst_19 = arith.constant dense<0.000000e+00> : vector<8x128xf32>
    %35 = tpu.matmul %30, %1, %cst_19 {dimension_numbers = #tpu.dot_dimension_numbers<[1], [0], [0], [1], [0, 0, 1, 1], [], []>} : vector<8x128xf32>, vector<128x128xf32>, vector<8x128xf32> -> vector<8x128xf32>
    %36 = arith.addf %34, %35 : vector<8x128xf32>
    %37 = arith.negf %36 : vector<8x128xf32>
    %38 = math.exp %37 : vector<8x128xf32>
    %cst_20 = arith.constant 1.000000e+00 : f32
    %39 = vector.broadcast %cst_20 : f32 to vector<8x128xf32>
    %40 = arith.addf %39, %38 : vector<8x128xf32>
    %41 = arith.divf %39, %40 : vector<8x128xf32>
    %42 = math.tanh %36 : vector<8x128xf32>
    %c64_i32_21 = arith.constant 64 : i32
    %43 = tpu.dynamic_rotate %41 by %c64_i32_21 dim 1 : vector<8x128xf32>, i32 -> vector<8x128xf32>
    %c32_i32_22 = arith.constant 32 : i32
    %44 = tpu.dynamic_rotate %41 by %c32_i32_22 dim 1 : vector<8x128xf32>, i32 -> vector<8x128xf32>
    %c96_i32_23 = arith.constant 96 : i32
    %45 = tpu.dynamic_rotate %41 by %c96_i32_23 dim 1 : vector<8x128xf32>, i32 -> vector<8x128xf32>
    %46 = arith.mulf %44, %31 : vector<8x128xf32>
    %47 = arith.mulf %43, %42 : vector<8x128xf32>
    %48 = arith.addf %46, %47 : vector<8x128xf32>
    %49 = math.tanh %48 : vector<8x128xf32>
    %50 = arith.mulf %45, %49 : vector<8x128xf32>
    %c8_24 = arith.constant 8 : index
    %c0_25 = arith.constant 0 : index
    %51 = vector.load %arg1[%c8_24, %c0_25] : memref<64x128xf32, #tpu.memory_space<vmem>>, vector<8x128xf32>
    %cst_26 = arith.constant 0.000000e+00 : f32
    %52 = vector.broadcast %cst_26 : f32 to vector<8x128xf32>
    %53 = arith.cmpf one, %51, %52 : vector<8x128xf32>
    %54 = arith.select %53, %50, %30 : vector<8x128xi1>, vector<8x128xf32>
    %55 = arith.select %53, %48, %31 : vector<8x128xi1>, vector<8x128xf32>
    %56 = arith.mulf %51, %50 : vector<8x128xf32>
    %c8_27 = arith.constant 8 : index
    %c0_28 = arith.constant 0 : index
    %57 = vector.load %arg5[%c8_27, %c0_28] : memref<64x128xf32, #tpu.memory_space<vmem>>, vector<8x128xf32>
    tpu.vector_store %arg5[%c8_27, %c0_28], %56 {strides = array<i32>} : memref<64x128xf32, #tpu.memory_space<vmem>>, vector<8x128xf32>,
    %c16 = arith.constant 16 : index
    %c0_29 = arith.constant 0 : index
    %58 = vector.load %arg4[%c16, %c0_29] : memref<64x128xf32, #tpu.memory_space<vmem>>, vector<8x128xf32>
    %cst_30 = arith.constant dense<0.000000e+00> : vector<8x128xf32>
    %59 = tpu.matmul %54, %1, %cst_30 {dimension_numbers = #tpu.dot_dimension_numbers<[1], [0], [0], [1], [0, 0, 1, 1], [], []>} : vector<8x128xf32>, vector<128x128xf32>, vector<8x128xf32> -> vector<8x128xf32>
    %60 = arith.addf %58, %59 : vector<8x128xf32>
    %61 = arith.negf %60 : vector<8x128xf32>
    %62 = math.exp %61 : vector<8x128xf32>
    %cst_31 = arith.constant 1.000000e+00 : f32
    %63 = vector.broadcast %cst_31 : f32 to vector<8x128xf32>
    %64 = arith.addf %63, %62 : vector<8x128xf32>
    %65 = arith.divf %63, %64 : vector<8x128xf32>
    %66 = math.tanh %60 : vector<8x128xf32>
    %c64_i32_32 = arith.constant 64 : i32
    %67 = tpu.dynamic_rotate %65 by %c64_i32_32 dim 1 : vector<8x128xf32>, i32 -> vector<8x128xf32>
    %c32_i32_33 = arith.constant 32 : i32
    %68 = tpu.dynamic_rotate %65 by %c32_i32_33 dim 1 : vector<8x128xf32>, i32 -> vector<8x128xf32>
    %c96_i32_34 = arith.constant 96 : i32
    %69 = tpu.dynamic_rotate %65 by %c96_i32_34 dim 1 : vector<8x128xf32>, i32 -> vector<8x128xf32>
    %70 = arith.mulf %68, %55 : vector<8x128xf32>
    %71 = arith.mulf %67, %66 : vector<8x128xf32>
    %72 = arith.addf %70, %71 : vector<8x128xf32>
    %73 = math.tanh %72 : vector<8x128xf32>
    %74 = arith.mulf %69, %73 : vector<8x128xf32>
    %c16_35 = arith.constant 16 : index
    %c0_36 = arith.constant 0 : index
    %75 = vector.load %arg1[%c16_35, %c0_36] : memref<64x128xf32, #tpu.memory_space<vmem>>, vector<8x128xf32>
    %cst_37 = arith.constant 0.000000e+00 : f32
    %76 = vector.broadcast %cst_37 : f32 to vector<8x128xf32>
    %77 = arith.cmpf one, %75, %76 : vector<8x128xf32>
    %78 = arith.select %77, %74, %54 : vector<8x128xi1>, vector<8x128xf32>
    %79 = arith.select %77, %72, %55 : vector<8x128xi1>, vector<8x128xf32>
    %80 = arith.mulf %75, %74 : vector<8x128xf32>
    %c16_38 = arith.constant 16 : index
    %c0_39 = arith.constant 0 : index
    %81 = vector.load %arg5[%c16_38, %c0_39] : memref<64x128xf32, #tpu.memory_space<vmem>>, vector<8x128xf32>
    tpu.vector_store %arg5[%c16_38, %c0_39], %80 {strides = array<i32>} : memref<64x128xf32, #tpu.memory_space<vmem>>, vector<8x128xf32>,
    %c24 = arith.constant 24 : index
    %c0_40 = arith.constant 0 : index
    %82 = vector.load %arg4[%c24, %c0_40] : memref<64x128xf32, #tpu.memory_space<vmem>>, vector<8x128xf32>
    %cst_41 = arith.constant dense<0.000000e+00> : vector<8x128xf32>
    %83 = tpu.matmul %78, %1, %cst_41 {dimension_numbers = #tpu.dot_dimension_numbers<[1], [0], [0], [1], [0, 0, 1, 1], [], []>} : vector<8x128xf32>, vector<128x128xf32>, vector<8x128xf32> -> vector<8x128xf32>
    %84 = arith.addf %82, %83 : vector<8x128xf32>
    %85 = arith.negf %84 : vector<8x128xf32>
    %86 = math.exp %85 : vector<8x128xf32>
    %cst_42 = arith.constant 1.000000e+00 : f32
    %87 = vector.broadcast %cst_42 : f32 to vector<8x128xf32>
    %88 = arith.addf %87, %86 : vector<8x128xf32>
    %89 = arith.divf %87, %88 : vector<8x128xf32>
    %90 = math.tanh %84 : vector<8x128xf32>
    %c64_i32_43 = arith.constant 64 : i32
    %91 = tpu.dynamic_rotate %89 by %c64_i32_43 dim 1 : vector<8x128xf32>, i32 -> vector<8x128xf32>
    %c32_i32_44 = arith.constant 32 : i32
    %92 = tpu.dynamic_rotate %89 by %c32_i32_44 dim 1 : vector<8x128xf32>, i32 -> vector<8x128xf32>
    %c96_i32_45 = arith.constant 96 : i32
    %93 = tpu.dynamic_rotate %89 by %c96_i32_45 dim 1 : vector<8x128xf32>, i32 -> vector<8x128xf32>
    %94 = arith.mulf %92, %79 : vector<8x128xf32>
    %95 = arith.mulf %91, %90 : vector<8x128xf32>
    %96 = arith.addf %94, %95 : vector<8x128xf32>
    %97 = math.tanh %96 : vector<8x128xf32>
    %98 = arith.mulf %93, %97 : vector<8x128xf32>
    %c24_46 = arith.constant 24 : index
    %c0_47 = arith.constant 0 : index
    %99 = vector.load %arg1[%c24_46, %c0_47] : memref<64x128xf32, #tpu.memory_space<vmem>>, vector<8x128xf32>
    %cst_48 = arith.constant 0.000000e+00 : f32
    %100 = vector.broadcast %cst_48 : f32 to vector<8x128xf32>
    %101 = arith.cmpf one, %99, %100 : vector<8x128xf32>
    %102 = arith.select %101, %98, %78 : vector<8x128xi1>, vector<8x128xf32>
    %103 = arith.select %101, %96, %79 : vector<8x128xi1>, vector<8x128xf32>
    %104 = arith.mulf %99, %98 : vector<8x128xf32>
    %c24_49 = arith.constant 24 : index
    %c0_50 = arith.constant 0 : index
    %105 = vector.load %arg5[%c24_49, %c0_50] : memref<64x128xf32, #tpu.memory_space<vmem>>, vector<8x128xf32>
    tpu.vector_store %arg5[%c24_49, %c0_50], %104 {strides = array<i32>} : memref<64x128xf32, #tpu.memory_space<vmem>>, vector<8x128xf32>,
    %c32_51 = arith.constant 32 : index
    %c0_52 = arith.constant 0 : index
    %106 = vector.load %arg4[%c32_51, %c0_52] : memref<64x128xf32, #tpu.memory_space<vmem>>, vector<8x128xf32>
    %cst_53 = arith.constant dense<0.000000e+00> : vector<8x128xf32>
    %107 = tpu.matmul %102, %1, %cst_53 {dimension_numbers = #tpu.dot_dimension_numbers<[1], [0], [0], [1], [0, 0, 1, 1], [], []>} : vector<8x128xf32>, vector<128x128xf32>, vector<8x128xf32> -> vector<8x128xf32>
    %108 = arith.addf %106, %107 : vector<8x128xf32>
    %109 = arith.negf %108 : vector<8x128xf32>
    %110 = math.exp %109 : vector<8x128xf32>
    %cst_54 = arith.constant 1.000000e+00 : f32
    %111 = vector.broadcast %cst_54 : f32 to vector<8x128xf32>
    %112 = arith.addf %111, %110 : vector<8x128xf32>
    %113 = arith.divf %111, %112 : vector<8x128xf32>
    %114 = math.tanh %108 : vector<8x128xf32>
    %c64_i32_55 = arith.constant 64 : i32
    %115 = tpu.dynamic_rotate %113 by %c64_i32_55 dim 1 : vector<8x128xf32>, i32 -> vector<8x128xf32>
    %c32_i32_56 = arith.constant 32 : i32
    %116 = tpu.dynamic_rotate %113 by %c32_i32_56 dim 1 : vector<8x128xf32>, i32 -> vector<8x128xf32>
    %c96_i32_57 = arith.constant 96 : i32
    %117 = tpu.dynamic_rotate %113 by %c96_i32_57 dim 1 : vector<8x128xf32>, i32 -> vector<8x128xf32>
    %118 = arith.mulf %116, %103 : vector<8x128xf32>
    %119 = arith.mulf %115, %114 : vector<8x128xf32>
    %120 = arith.addf %118, %119 : vector<8x128xf32>
    %121 = math.tanh %120 : vector<8x128xf32>
    %122 = arith.mulf %117, %121 : vector<8x128xf32>
    %c32_58 = arith.constant 32 : index
    %c0_59 = arith.constant 0 : index
    %123 = vector.load %arg1[%c32_58, %c0_59] : memref<64x128xf32, #tpu.memory_space<vmem>>, vector<8x128xf32>
    %cst_60 = arith.constant 0.000000e+00 : f32
    %124 = vector.broadcast %cst_60 : f32 to vector<8x128xf32>
    %125 = arith.cmpf one, %123, %124 : vector<8x128xf32>
    %126 = arith.select %125, %122, %102 : vector<8x128xi1>, vector<8x128xf32>
    %127 = arith.select %125, %120, %103 : vector<8x128xi1>, vector<8x128xf32>
    %128 = arith.mulf %123, %122 : vector<8x128xf32>
    %c32_61 = arith.constant 32 : index
    %c0_62 = arith.constant 0 : index
    %129 = vector.load %arg5[%c32_61, %c0_62] : memref<64x128xf32, #tpu.memory_space<vmem>>, vector<8x128xf32>
    tpu.vector_store %arg5[%c32_61, %c0_62], %128 {strides = array<i32>} : memref<64x128xf32, #tpu.memory_space<vmem>>, vector<8x128xf32>,
    %c40 = arith.constant 40 : index
    %c0_63 = arith.constant 0 : index
    %130 = vector.load %arg4[%c40, %c0_63] : memref<64x128xf32, #tpu.memory_space<vmem>>, vector<8x128xf32>
    %cst_64 = arith.constant dense<0.000000e+00> : vector<8x128xf32>
    %131 = tpu.matmul %126, %1, %cst_64 {dimension_numbers = #tpu.dot_dimension_numbers<[1], [0], [0], [1], [0, 0, 1, 1], [], []>} : vector<8x128xf32>, vector<128x128xf32>, vector<8x128xf32> -> vector<8x128xf32>
    %132 = arith.addf %130, %131 : vector<8x128xf32>
    %133 = arith.negf %132 : vector<8x128xf32>
    %134 = math.exp %133 : vector<8x128xf32>
    %cst_65 = arith.constant 1.000000e+00 : f32
    %135 = vector.broadcast %cst_65 : f32 to vector<8x128xf32>
    %136 = arith.addf %135, %134 : vector<8x128xf32>
    %137 = arith.divf %135, %136 : vector<8x128xf32>
    %138 = math.tanh %132 : vector<8x128xf32>
    %c64_i32_66 = arith.constant 64 : i32
    %139 = tpu.dynamic_rotate %137 by %c64_i32_66 dim 1 : vector<8x128xf32>, i32 -> vector<8x128xf32>
    %c32_i32_67 = arith.constant 32 : i32
    %140 = tpu.dynamic_rotate %137 by %c32_i32_67 dim 1 : vector<8x128xf32>, i32 -> vector<8x128xf32>
    %c96_i32_68 = arith.constant 96 : i32
    %141 = tpu.dynamic_rotate %137 by %c96_i32_68 dim 1 : vector<8x128xf32>, i32 -> vector<8x128xf32>
    %142 = arith.mulf %140, %127 : vector<8x128xf32>
    %143 = arith.mulf %139, %138 : vector<8x128xf32>
    %144 = arith.addf %142, %143 : vector<8x128xf32>
    %145 = math.tanh %144 : vector<8x128xf32>
    %146 = arith.mulf %141, %145 : vector<8x128xf32>
    %c40_69 = arith.constant 40 : index
    %c0_70 = arith.constant 0 : index
    %147 = vector.load %arg1[%c40_69, %c0_70] : memref<64x128xf32, #tpu.memory_space<vmem>>, vector<8x128xf32>
    %cst_71 = arith.constant 0.000000e+00 : f32
    %148 = vector.broadcast %cst_71 : f32 to vector<8x128xf32>
    %149 = arith.cmpf one, %147, %148 : vector<8x128xf32>
    %150 = arith.select %149, %146, %126 : vector<8x128xi1>, vector<8x128xf32>
    %151 = arith.select %149, %144, %127 : vector<8x128xi1>, vector<8x128xf32>
    %152 = arith.mulf %147, %146 : vector<8x128xf32>
    %c40_72 = arith.constant 40 : index
    %c0_73 = arith.constant 0 : index
    %153 = vector.load %arg5[%c40_72, %c0_73] : memref<64x128xf32, #tpu.memory_space<vmem>>, vector<8x128xf32>
    tpu.vector_store %arg5[%c40_72, %c0_73], %152 {strides = array<i32>} : memref<64x128xf32, #tpu.memory_space<vmem>>, vector<8x128xf32>,
    %c48 = arith.constant 48 : index
    %c0_74 = arith.constant 0 : index
    %154 = vector.load %arg4[%c48, %c0_74] : memref<64x128xf32, #tpu.memory_space<vmem>>, vector<8x128xf32>
    %cst_75 = arith.constant dense<0.000000e+00> : vector<8x128xf32>
    %155 = tpu.matmul %150, %1, %cst_75 {dimension_numbers = #tpu.dot_dimension_numbers<[1], [0], [0], [1], [0, 0, 1, 1], [], []>} : vector<8x128xf32>, vector<128x128xf32>, vector<8x128xf32> -> vector<8x128xf32>
    %156 = arith.addf %154, %155 : vector<8x128xf32>
    %157 = arith.negf %156 : vector<8x128xf32>
    %158 = math.exp %157 : vector<8x128xf32>
    %cst_76 = arith.constant 1.000000e+00 : f32
    %159 = vector.broadcast %cst_76 : f32 to vector<8x128xf32>
    %160 = arith.addf %159, %158 : vector<8x128xf32>
    %161 = arith.divf %159, %160 : vector<8x128xf32>
    %162 = math.tanh %156 : vector<8x128xf32>
    %c64_i32_77 = arith.constant 64 : i32
    %163 = tpu.dynamic_rotate %161 by %c64_i32_77 dim 1 : vector<8x128xf32>, i32 -> vector<8x128xf32>
    %c32_i32_78 = arith.constant 32 : i32
    %164 = tpu.dynamic_rotate %161 by %c32_i32_78 dim 1 : vector<8x128xf32>, i32 -> vector<8x128xf32>
    %c96_i32_79 = arith.constant 96 : i32
    %165 = tpu.dynamic_rotate %161 by %c96_i32_79 dim 1 : vector<8x128xf32>, i32 -> vector<8x128xf32>
    %166 = arith.mulf %164, %151 : vector<8x128xf32>
    %167 = arith.mulf %163, %162 : vector<8x128xf32>
    %168 = arith.addf %166, %167 : vector<8x128xf32>
    %169 = math.tanh %168 : vector<8x128xf32>
    %170 = arith.mulf %165, %169 : vector<8x128xf32>
    %c48_80 = arith.constant 48 : index
    %c0_81 = arith.constant 0 : index
    %171 = vector.load %arg1[%c48_80, %c0_81] : memref<64x128xf32, #tpu.memory_space<vmem>>, vector<8x128xf32>
    %cst_82 = arith.constant 0.000000e+00 : f32
    %172 = vector.broadcast %cst_82 : f32 to vector<8x128xf32>
    %173 = arith.cmpf one, %171, %172 : vector<8x128xf32>
    %174 = arith.select %173, %170, %150 : vector<8x128xi1>, vector<8x128xf32>
    %175 = arith.select %173, %168, %151 : vector<8x128xi1>, vector<8x128xf32>
    %176 = arith.mulf %171, %170 : vector<8x128xf32>
    %c48_83 = arith.constant 48 : index
    %c0_84 = arith.constant 0 : index
    %177 = vector.load %arg5[%c48_83, %c0_84] : memref<64x128xf32, #tpu.memory_space<vmem>>, vector<8x128xf32>
    tpu.vector_store %arg5[%c48_83, %c0_84], %176 {strides = array<i32>} : memref<64x128xf32, #tpu.memory_space<vmem>>, vector<8x128xf32>,
    %c56 = arith.constant 56 : index
    %c0_85 = arith.constant 0 : index
    %178 = vector.load %arg4[%c56, %c0_85] : memref<64x128xf32, #tpu.memory_space<vmem>>, vector<8x128xf32>
    %cst_86 = arith.constant dense<0.000000e+00> : vector<8x128xf32>
    %179 = tpu.matmul %174, %1, %cst_86 {dimension_numbers = #tpu.dot_dimension_numbers<[1], [0], [0], [1], [0, 0, 1, 1], [], []>} : vector<8x128xf32>, vector<128x128xf32>, vector<8x128xf32> -> vector<8x128xf32>
    %180 = arith.addf %178, %179 : vector<8x128xf32>
    %181 = arith.negf %180 : vector<8x128xf32>
    %182 = math.exp %181 : vector<8x128xf32>
    %cst_87 = arith.constant 1.000000e+00 : f32
    %183 = vector.broadcast %cst_87 : f32 to vector<8x128xf32>
    %184 = arith.addf %183, %182 : vector<8x128xf32>
    %185 = arith.divf %183, %184 : vector<8x128xf32>
    %186 = math.tanh %180 : vector<8x128xf32>
    %c64_i32_88 = arith.constant 64 : i32
    %187 = tpu.dynamic_rotate %185 by %c64_i32_88 dim 1 : vector<8x128xf32>, i32 -> vector<8x128xf32>
    %c32_i32_89 = arith.constant 32 : i32
    %188 = tpu.dynamic_rotate %185 by %c32_i32_89 dim 1 : vector<8x128xf32>, i32 -> vector<8x128xf32>
    %c96_i32_90 = arith.constant 96 : i32
    %189 = tpu.dynamic_rotate %185 by %c96_i32_90 dim 1 : vector<8x128xf32>, i32 -> vector<8x128xf32>
    %190 = arith.mulf %188, %175 : vector<8x128xf32>
    %191 = arith.mulf %187, %186 : vector<8x128xf32>
    %192 = arith.addf %190, %191 : vector<8x128xf32>
    %193 = math.tanh %192 : vector<8x128xf32>
    %194 = arith.mulf %189, %193 : vector<8x128xf32>
    %c56_91 = arith.constant 56 : index
    %c0_92 = arith.constant 0 : index
    %195 = vector.load %arg1[%c56_91, %c0_92] : memref<64x128xf32, #tpu.memory_space<vmem>>, vector<8x128xf32>
    %196 = arith.mulf %195, %194 : vector<8x128xf32>
    %c56_93 = arith.constant 56 : index
    %c0_94 = arith.constant 0 : index
    %197 = vector.load %arg5[%c56_93, %c0_94] : memref<64x128xf32, #tpu.memory_space<vmem>>, vector<8x128xf32>
    tpu.vector_store %arg5[%c56_93, %c0_94], %196 {strides = array<i32>} : memref<64x128xf32, #tpu.memory_space<vmem>>, vector<8x128xf32>,
    %c168 = arith.constant 168 : index
    %c0_95 = arith.constant 0 : index
    %198 = vector.load %arg2[%c168, %c0_95] : memref<568x128xf32, #tpu.memory_space<vmem>>, vector<128x128xf32>
    %c296 = arith.constant 296 : index
    %c0_96 = arith.constant 0 : index
    %199 = vector.load %arg2[%c296, %c0_96] : memref<568x128xf32, #tpu.memory_space<vmem>>, vector<128x128xf32>
    %c424 = arith.constant 424 : index
    %c0_97 = arith.constant 0 : index
    %200 = vector.load %arg2[%c424, %c0_97] : memref<568x128xf32, #tpu.memory_space<vmem>>, vector<1x128xf32>
    %c0_98 = arith.constant 0 : index
    %c0_99 = arith.constant 0 : index
    %201 = vector.load %arg5[%c0_98, %c0_99] : memref<64x128xf32, #tpu.memory_space<vmem>>, vector<64x128xf32>
    %cst_100 = arith.constant dense<0.000000e+00> : vector<64x128xf32>
    %202 = tpu.matmul %201, %198, %cst_100 {dimension_numbers = #tpu.dot_dimension_numbers<[1], [0], [0], [1], [0, 0, 1, 1], [], []>} : vector<64x128xf32>, vector<128x128xf32>, vector<64x128xf32> -> vector<64x128xf32>
    %203 = vector.broadcast %200 : vector<1x128xf32> to vector<64x128xf32>
    %204 = arith.addf %202, %203 : vector<64x128xf32>
    %c0_101 = arith.constant 0 : index
    %c0_102 = arith.constant 0 : index
    %205 = vector.load %arg4[%c0_101, %c0_102] : memref<64x128xf32, #tpu.memory_space<vmem>>, vector<64x128xf32>
    tpu.vector_store %arg4[%c0_101, %c0_102], %204 {strides = array<i32>} : memref<64x128xf32, #tpu.memory_space<vmem>>, vector<64x128xf32>,
    %cst_103 = arith.constant 0.000000e+00 : f32
    %206 = vector.broadcast %cst_103 : f32 to vector<8x128xf32>
    %cst_104 = arith.constant 0.000000e+00 : f32
    %207 = vector.broadcast %cst_104 : f32 to vector<8x128xf32>
    %c0_105 = arith.constant 0 : index
    %c0_106 = arith.constant 0 : index
    %208 = vector.load %arg4[%c0_105, %c0_106] : memref<64x128xf32, #tpu.memory_space<vmem>>, vector<8x128xf32>
    %cst_107 = arith.constant dense<0.000000e+00> : vector<8x128xf32>
    %209 = tpu.matmul %206, %199, %cst_107 {dimension_numbers = #tpu.dot_dimension_numbers<[1], [0], [0], [1], [0, 0, 1, 1], [], []>} : vector<8x128xf32>, vector<128x128xf32>, vector<8x128xf32> -> vector<8x128xf32>
    %210 = arith.addf %208, %209 : vector<8x128xf32>
    %211 = arith.negf %210 : vector<8x128xf32>
    %212 = math.exp %211 : vector<8x128xf32>
    %cst_108 = arith.constant 1.000000e+00 : f32
    %213 = vector.broadcast %cst_108 : f32 to vector<8x128xf32>
    %214 = arith.addf %213, %212 : vector<8x128xf32>
    %215 = arith.divf %213, %214 : vector<8x128xf32>
    %216 = math.tanh %210 : vector<8x128xf32>
    %c64_i32_109 = arith.constant 64 : i32
    %217 = tpu.dynamic_rotate %215 by %c64_i32_109 dim 1 : vector<8x128xf32>, i32 -> vector<8x128xf32>
    %c32_i32_110 = arith.constant 32 : i32
    %218 = tpu.dynamic_rotate %215 by %c32_i32_110 dim 1 : vector<8x128xf32>, i32 -> vector<8x128xf32>
    %c96_i32_111 = arith.constant 96 : i32
    %219 = tpu.dynamic_rotate %215 by %c96_i32_111 dim 1 : vector<8x128xf32>, i32 -> vector<8x128xf32>
    %220 = arith.mulf %218, %207 : vector<8x128xf32>
    %221 = arith.mulf %217, %216 : vector<8x128xf32>
    %222 = arith.addf %220, %221 : vector<8x128xf32>
    %223 = math.tanh %222 : vector<8x128xf32>
    %224 = arith.mulf %219, %223 : vector<8x128xf32>
    %c0_112 = arith.constant 0 : index
    %c0_113 = arith.constant 0 : index
    %225 = vector.load %arg1[%c0_112, %c0_113] : memref<64x128xf32, #tpu.memory_space<vmem>>, vector<8x128xf32>
    %cst_114 = arith.constant 0.000000e+00 : f32
    %226 = vector.broadcast %cst_114 : f32 to vector<8x128xf32>
    %227 = arith.cmpf one, %225, %226 : vector<8x128xf32>
    %228 = arith.select %227, %224, %206 : vector<8x128xi1>, vector<8x128xf32>
    %229 = arith.select %227, %222, %207 : vector<8x128xi1>, vector<8x128xf32>
    %c8_115 = arith.constant 8 : index
    %c0_116 = arith.constant 0 : index
    %230 = vector.load %arg4[%c8_115, %c0_116] : memref<64x128xf32, #tpu.memory_space<vmem>>, vector<8x128xf32>
    %cst_117 = arith.constant dense<0.000000e+00> : vector<8x128xf32>
    %231 = tpu.matmul %228, %199, %cst_117 {dimension_numbers = #tpu.dot_dimension_numbers<[1], [0], [0], [1], [0, 0, 1, 1], [], []>} : vector<8x128xf32>, vector<128x128xf32>, vector<8x128xf32> -> vector<8x128xf32>
    %232 = arith.addf %230, %231 : vector<8x128xf32>
    %233 = arith.negf %232 : vector<8x128xf32>
    %234 = math.exp %233 : vector<8x128xf32>
    %cst_118 = arith.constant 1.000000e+00 : f32
    %235 = vector.broadcast %cst_118 : f32 to vector<8x128xf32>
    %236 = arith.addf %235, %234 : vector<8x128xf32>
    %237 = arith.divf %235, %236 : vector<8x128xf32>
    %238 = math.tanh %232 : vector<8x128xf32>
    %c64_i32_119 = arith.constant 64 : i32
    %239 = tpu.dynamic_rotate %237 by %c64_i32_119 dim 1 : vector<8x128xf32>, i32 -> vector<8x128xf32>
    %c32_i32_120 = arith.constant 32 : i32
    %240 = tpu.dynamic_rotate %237 by %c32_i32_120 dim 1 : vector<8x128xf32>, i32 -> vector<8x128xf32>
    %c96_i32_121 = arith.constant 96 : i32
    %241 = tpu.dynamic_rotate %237 by %c96_i32_121 dim 1 : vector<8x128xf32>, i32 -> vector<8x128xf32>
    %242 = arith.mulf %240, %229 : vector<8x128xf32>
    %243 = arith.mulf %239, %238 : vector<8x128xf32>
    %244 = arith.addf %242, %243 : vector<8x128xf32>
    %245 = math.tanh %244 : vector<8x128xf32>
    %246 = arith.mulf %241, %245 : vector<8x128xf32>
    %c8_122 = arith.constant 8 : index
    %c0_123 = arith.constant 0 : index
    %247 = vector.load %arg1[%c8_122, %c0_123] : memref<64x128xf32, #tpu.memory_space<vmem>>, vector<8x128xf32>
    %cst_124 = arith.constant 0.000000e+00 : f32
    %248 = vector.broadcast %cst_124 : f32 to vector<8x128xf32>
    %249 = arith.cmpf one, %247, %248 : vector<8x128xf32>
    %250 = arith.select %249, %246, %228 : vector<8x128xi1>, vector<8x128xf32>
    %251 = arith.select %249, %244, %229 : vector<8x128xi1>, vector<8x128xf32>
    %c16_125 = arith.constant 16 : index
    %c0_126 = arith.constant 0 : index
    %252 = vector.load %arg4[%c16_125, %c0_126] : memref<64x128xf32, #tpu.memory_space<vmem>>, vector<8x128xf32>
    %cst_127 = arith.constant dense<0.000000e+00> : vector<8x128xf32>
    %253 = tpu.matmul %250, %199, %cst_127 {dimension_numbers = #tpu.dot_dimension_numbers<[1], [0], [0], [1], [0, 0, 1, 1], [], []>} : vector<8x128xf32>, vector<128x128xf32>, vector<8x128xf32> -> vector<8x128xf32>
    %254 = arith.addf %252, %253 : vector<8x128xf32>
    %255 = arith.negf %254 : vector<8x128xf32>
    %256 = math.exp %255 : vector<8x128xf32>
    %cst_128 = arith.constant 1.000000e+00 : f32
    %257 = vector.broadcast %cst_128 : f32 to vector<8x128xf32>
    %258 = arith.addf %257, %256 : vector<8x128xf32>
    %259 = arith.divf %257, %258 : vector<8x128xf32>
    %260 = math.tanh %254 : vector<8x128xf32>
    %c64_i32_129 = arith.constant 64 : i32
    %261 = tpu.dynamic_rotate %259 by %c64_i32_129 dim 1 : vector<8x128xf32>, i32 -> vector<8x128xf32>
    %c32_i32_130 = arith.constant 32 : i32
    %262 = tpu.dynamic_rotate %259 by %c32_i32_130 dim 1 : vector<8x128xf32>, i32 -> vector<8x128xf32>
    %c96_i32_131 = arith.constant 96 : i32
    %263 = tpu.dynamic_rotate %259 by %c96_i32_131 dim 1 : vector<8x128xf32>, i32 -> vector<8x128xf32>
    %264 = arith.mulf %262, %251 : vector<8x128xf32>
    %265 = arith.mulf %261, %260 : vector<8x128xf32>
    %266 = arith.addf %264, %265 : vector<8x128xf32>
    %267 = math.tanh %266 : vector<8x128xf32>
    %268 = arith.mulf %263, %267 : vector<8x128xf32>
    %c16_132 = arith.constant 16 : index
    %c0_133 = arith.constant 0 : index
    %269 = vector.load %arg1[%c16_132, %c0_133] : memref<64x128xf32, #tpu.memory_space<vmem>>, vector<8x128xf32>
    %cst_134 = arith.constant 0.000000e+00 : f32
    %270 = vector.broadcast %cst_134 : f32 to vector<8x128xf32>
    %271 = arith.cmpf one, %269, %270 : vector<8x128xf32>
    %272 = arith.select %271, %268, %250 : vector<8x128xi1>, vector<8x128xf32>
    %273 = arith.select %271, %266, %251 : vector<8x128xi1>, vector<8x128xf32>
    %c24_135 = arith.constant 24 : index
    %c0_136 = arith.constant 0 : index
    %274 = vector.load %arg4[%c24_135, %c0_136] : memref<64x128xf32, #tpu.memory_space<vmem>>, vector<8x128xf32>
    %cst_137 = arith.constant dense<0.000000e+00> : vector<8x128xf32>
    %275 = tpu.matmul %272, %199, %cst_137 {dimension_numbers = #tpu.dot_dimension_numbers<[1], [0], [0], [1], [0, 0, 1, 1], [], []>} : vector<8x128xf32>, vector<128x128xf32>, vector<8x128xf32> -> vector<8x128xf32>
    %276 = arith.addf %274, %275 : vector<8x128xf32>
    %277 = arith.negf %276 : vector<8x128xf32>
    %278 = math.exp %277 : vector<8x128xf32>
    %cst_138 = arith.constant 1.000000e+00 : f32
    %279 = vector.broadcast %cst_138 : f32 to vector<8x128xf32>
    %280 = arith.addf %279, %278 : vector<8x128xf32>
    %281 = arith.divf %279, %280 : vector<8x128xf32>
    %282 = math.tanh %276 : vector<8x128xf32>
    %c64_i32_139 = arith.constant 64 : i32
    %283 = tpu.dynamic_rotate %281 by %c64_i32_139 dim 1 : vector<8x128xf32>, i32 -> vector<8x128xf32>
    %c32_i32_140 = arith.constant 32 : i32
    %284 = tpu.dynamic_rotate %281 by %c32_i32_140 dim 1 : vector<8x128xf32>, i32 -> vector<8x128xf32>
    %c96_i32_141 = arith.constant 96 : i32
    %285 = tpu.dynamic_rotate %281 by %c96_i32_141 dim 1 : vector<8x128xf32>, i32 -> vector<8x128xf32>
    %286 = arith.mulf %284, %273 : vector<8x128xf32>
    %287 = arith.mulf %283, %282 : vector<8x128xf32>
    %288 = arith.addf %286, %287 : vector<8x128xf32>
    %289 = math.tanh %288 : vector<8x128xf32>
    %290 = arith.mulf %285, %289 : vector<8x128xf32>
    %c24_142 = arith.constant 24 : index
    %c0_143 = arith.constant 0 : index
    %291 = vector.load %arg1[%c24_142, %c0_143] : memref<64x128xf32, #tpu.memory_space<vmem>>, vector<8x128xf32>
    %cst_144 = arith.constant 0.000000e+00 : f32
    %292 = vector.broadcast %cst_144 : f32 to vector<8x128xf32>
    %293 = arith.cmpf one, %291, %292 : vector<8x128xf32>
    %294 = arith.select %293, %290, %272 : vector<8x128xi1>, vector<8x128xf32>
    %295 = arith.select %293, %288, %273 : vector<8x128xi1>, vector<8x128xf32>
    %c32_145 = arith.constant 32 : index
    %c0_146 = arith.constant 0 : index
    %296 = vector.load %arg4[%c32_145, %c0_146] : memref<64x128xf32, #tpu.memory_space<vmem>>, vector<8x128xf32>
    %cst_147 = arith.constant dense<0.000000e+00> : vector<8x128xf32>
    %297 = tpu.matmul %294, %199, %cst_147 {dimension_numbers = #tpu.dot_dimension_numbers<[1], [0], [0], [1], [0, 0, 1, 1], [], []>} : vector<8x128xf32>, vector<128x128xf32>, vector<8x128xf32> -> vector<8x128xf32>
    %298 = arith.addf %296, %297 : vector<8x128xf32>
    %299 = arith.negf %298 : vector<8x128xf32>
    %300 = math.exp %299 : vector<8x128xf32>
    %cst_148 = arith.constant 1.000000e+00 : f32
    %301 = vector.broadcast %cst_148 : f32 to vector<8x128xf32>
    %302 = arith.addf %301, %300 : vector<8x128xf32>
    %303 = arith.divf %301, %302 : vector<8x128xf32>
    %304 = math.tanh %298 : vector<8x128xf32>
    %c64_i32_149 = arith.constant 64 : i32
    %305 = tpu.dynamic_rotate %303 by %c64_i32_149 dim 1 : vector<8x128xf32>, i32 -> vector<8x128xf32>
    %c32_i32_150 = arith.constant 32 : i32
    %306 = tpu.dynamic_rotate %303 by %c32_i32_150 dim 1 : vector<8x128xf32>, i32 -> vector<8x128xf32>
    %c96_i32_151 = arith.constant 96 : i32
    %307 = tpu.dynamic_rotate %303 by %c96_i32_151 dim 1 : vector<8x128xf32>, i32 -> vector<8x128xf32>
    %308 = arith.mulf %306, %295 : vector<8x128xf32>
    %309 = arith.mulf %305, %304 : vector<8x128xf32>
    %310 = arith.addf %308, %309 : vector<8x128xf32>
    %311 = math.tanh %310 : vector<8x128xf32>
    %312 = arith.mulf %307, %311 : vector<8x128xf32>
    %c32_152 = arith.constant 32 : index
    %c0_153 = arith.constant 0 : index
    %313 = vector.load %arg1[%c32_152, %c0_153] : memref<64x128xf32, #tpu.memory_space<vmem>>, vector<8x128xf32>
    %cst_154 = arith.constant 0.000000e+00 : f32
    %314 = vector.broadcast %cst_154 : f32 to vector<8x128xf32>
    %315 = arith.cmpf one, %313, %314 : vector<8x128xf32>
    %316 = arith.select %315, %312, %294 : vector<8x128xi1>, vector<8x128xf32>
    %317 = arith.select %315, %310, %295 : vector<8x128xi1>, vector<8x128xf32>
    %c40_155 = arith.constant 40 : index
    %c0_156 = arith.constant 0 : index
    %318 = vector.load %arg4[%c40_155, %c0_156] : memref<64x128xf32, #tpu.memory_space<vmem>>, vector<8x128xf32>
    %cst_157 = arith.constant dense<0.000000e+00> : vector<8x128xf32>
    %319 = tpu.matmul %316, %199, %cst_157 {dimension_numbers = #tpu.dot_dimension_numbers<[1], [0], [0], [1], [0, 0, 1, 1], [], []>} : vector<8x128xf32>, vector<128x128xf32>, vector<8x128xf32> -> vector<8x128xf32>
    %320 = arith.addf %318, %319 : vector<8x128xf32>
    %321 = arith.negf %320 : vector<8x128xf32>
    %322 = math.exp %321 : vector<8x128xf32>
    %cst_158 = arith.constant 1.000000e+00 : f32
    %323 = vector.broadcast %cst_158 : f32 to vector<8x128xf32>
    %324 = arith.addf %323, %322 : vector<8x128xf32>
    %325 = arith.divf %323, %324 : vector<8x128xf32>
    %326 = math.tanh %320 : vector<8x128xf32>
    %c64_i32_159 = arith.constant 64 : i32
    %327 = tpu.dynamic_rotate %325 by %c64_i32_159 dim 1 : vector<8x128xf32>, i32 -> vector<8x128xf32>
    %c32_i32_160 = arith.constant 32 : i32
    %328 = tpu.dynamic_rotate %325 by %c32_i32_160 dim 1 : vector<8x128xf32>, i32 -> vector<8x128xf32>
    %c96_i32_161 = arith.constant 96 : i32
    %329 = tpu.dynamic_rotate %325 by %c96_i32_161 dim 1 : vector<8x128xf32>, i32 -> vector<8x128xf32>
    %330 = arith.mulf %328, %317 : vector<8x128xf32>
    %331 = arith.mulf %327, %326 : vector<8x128xf32>
    %332 = arith.addf %330, %331 : vector<8x128xf32>
    %333 = math.tanh %332 : vector<8x128xf32>
    %334 = arith.mulf %329, %333 : vector<8x128xf32>
    %c40_162 = arith.constant 40 : index
    %c0_163 = arith.constant 0 : index
    %335 = vector.load %arg1[%c40_162, %c0_163] : memref<64x128xf32, #tpu.memory_space<vmem>>, vector<8x128xf32>
    %cst_164 = arith.constant 0.000000e+00 : f32
    %336 = vector.broadcast %cst_164 : f32 to vector<8x128xf32>
    %337 = arith.cmpf one, %335, %336 : vector<8x128xf32>
    %338 = arith.select %337, %334, %316 : vector<8x128xi1>, vector<8x128xf32>
    %339 = arith.select %337, %332, %317 : vector<8x128xi1>, vector<8x128xf32>
    %c48_165 = arith.constant 48 : index
    %c0_166 = arith.constant 0 : index
    %340 = vector.load %arg4[%c48_165, %c0_166] : memref<64x128xf32, #tpu.memory_space<vmem>>, vector<8x128xf32>
    %cst_167 = arith.constant dense<0.000000e+00> : vector<8x128xf32>
    %341 = tpu.matmul %338, %199, %cst_167 {dimension_numbers = #tpu.dot_dimension_numbers<[1], [0], [0], [1], [0, 0, 1, 1], [], []>} : vector<8x128xf32>, vector<128x128xf32>, vector<8x128xf32> -> vector<8x128xf32>
    %342 = arith.addf %340, %341 : vector<8x128xf32>
    %343 = arith.negf %342 : vector<8x128xf32>
    %344 = math.exp %343 : vector<8x128xf32>
    %cst_168 = arith.constant 1.000000e+00 : f32
    %345 = vector.broadcast %cst_168 : f32 to vector<8x128xf32>
    %346 = arith.addf %345, %344 : vector<8x128xf32>
    %347 = arith.divf %345, %346 : vector<8x128xf32>
    %348 = math.tanh %342 : vector<8x128xf32>
    %c64_i32_169 = arith.constant 64 : i32
    %349 = tpu.dynamic_rotate %347 by %c64_i32_169 dim 1 : vector<8x128xf32>, i32 -> vector<8x128xf32>
    %c32_i32_170 = arith.constant 32 : i32
    %350 = tpu.dynamic_rotate %347 by %c32_i32_170 dim 1 : vector<8x128xf32>, i32 -> vector<8x128xf32>
    %c96_i32_171 = arith.constant 96 : i32
    %351 = tpu.dynamic_rotate %347 by %c96_i32_171 dim 1 : vector<8x128xf32>, i32 -> vector<8x128xf32>
    %352 = arith.mulf %350, %339 : vector<8x128xf32>
    %353 = arith.mulf %349, %348 : vector<8x128xf32>
    %354 = arith.addf %352, %353 : vector<8x128xf32>
    %355 = math.tanh %354 : vector<8x128xf32>
    %356 = arith.mulf %351, %355 : vector<8x128xf32>
    %c48_172 = arith.constant 48 : index
    %c0_173 = arith.constant 0 : index
    %357 = vector.load %arg1[%c48_172, %c0_173] : memref<64x128xf32, #tpu.memory_space<vmem>>, vector<8x128xf32>
    %cst_174 = arith.constant 0.000000e+00 : f32
    %358 = vector.broadcast %cst_174 : f32 to vector<8x128xf32>
    %359 = arith.cmpf one, %357, %358 : vector<8x128xf32>
    %360 = arith.select %359, %356, %338 : vector<8x128xi1>, vector<8x128xf32>
    %361 = arith.select %359, %354, %339 : vector<8x128xi1>, vector<8x128xf32>
    %c56_175 = arith.constant 56 : index
    %c0_176 = arith.constant 0 : index
    %362 = vector.load %arg4[%c56_175, %c0_176] : memref<64x128xf32, #tpu.memory_space<vmem>>, vector<8x128xf32>
    %cst_177 = arith.constant dense<0.000000e+00> : vector<8x128xf32>
    %363 = tpu.matmul %360, %199, %cst_177 {dimension_numbers = #tpu.dot_dimension_numbers<[1], [0], [0], [1], [0, 0, 1, 1], [], []>} : vector<8x128xf32>, vector<128x128xf32>, vector<8x128xf32> -> vector<8x128xf32>
    %364 = arith.addf %362, %363 : vector<8x128xf32>
    %365 = arith.negf %364 : vector<8x128xf32>
    %366 = math.exp %365 : vector<8x128xf32>
    %cst_178 = arith.constant 1.000000e+00 : f32
    %367 = vector.broadcast %cst_178 : f32 to vector<8x128xf32>
    %368 = arith.addf %367, %366 : vector<8x128xf32>
    %369 = arith.divf %367, %368 : vector<8x128xf32>
    %370 = math.tanh %364 : vector<8x128xf32>
    %c64_i32_179 = arith.constant 64 : i32
    %371 = tpu.dynamic_rotate %369 by %c64_i32_179 dim 1 : vector<8x128xf32>, i32 -> vector<8x128xf32>
    %c32_i32_180 = arith.constant 32 : i32
    %372 = tpu.dynamic_rotate %369 by %c32_i32_180 dim 1 : vector<8x128xf32>, i32 -> vector<8x128xf32>
    %c96_i32_181 = arith.constant 96 : i32
    %373 = tpu.dynamic_rotate %369 by %c96_i32_181 dim 1 : vector<8x128xf32>, i32 -> vector<8x128xf32>
    %374 = arith.mulf %372, %361 : vector<8x128xf32>
    %375 = arith.mulf %371, %370 : vector<8x128xf32>
    %376 = arith.addf %374, %375 : vector<8x128xf32>
    %377 = math.tanh %376 : vector<8x128xf32>
    %378 = arith.mulf %373, %377 : vector<8x128xf32>
    %c56_182 = arith.constant 56 : index
    %c0_183 = arith.constant 0 : index
    %379 = vector.load %arg1[%c56_182, %c0_183] : memref<64x128xf32, #tpu.memory_space<vmem>>, vector<8x128xf32>
    %cst_184 = arith.constant 0.000000e+00 : f32
    %380 = vector.broadcast %cst_184 : f32 to vector<8x128xf32>
    %381 = arith.cmpf one, %379, %380 : vector<8x128xf32>
    %382 = arith.select %381, %378, %360 : vector<8x128xi1>, vector<8x128xf32>
    %c432 = arith.constant 432 : index
    %c0_185 = arith.constant 0 : index
    %383 = vector.load %arg2[%c432, %c0_185] : memref<568x128xf32, #tpu.memory_space<vmem>>, vector<128x128xf32>
    %c560 = arith.constant 560 : index
    %c0_186 = arith.constant 0 : index
    %384 = vector.load %arg2[%c560, %c0_186] : memref<568x128xf32, #tpu.memory_space<vmem>>, vector<1x128xf32>
    %cst_187 = arith.constant dense<0.000000e+00> : vector<8x128xf32>
    %385 = tpu.matmul %382, %383, %cst_187 {dimension_numbers = #tpu.dot_dimension_numbers<[1], [0], [0], [1], [0, 0, 1, 1], [], []>} : vector<8x128xf32>, vector<128x128xf32>, vector<8x128xf32> -> vector<8x128xf32>
    %386 = vector.broadcast %384 : vector<1x128xf32> to vector<8x128xf32>
    %387 = arith.addf %385, %386 : vector<8x128xf32>
    %c0_188 = arith.constant 0 : index
    %c0_189 = arith.constant 0 : index
    %388 = vector.load %arg3[%c0_188, %c0_189] : memref<8x128xf32, #tpu.memory_space<vmem>>, vector<8x128xf32>
    tpu.vector_store %arg3[%c0_188, %c0_189], %387 {strides = array<i32>} : memref<8x128xf32, #tpu.memory_space<vmem>>, vector<8x128xf32>,
    return
  }
}

</mosaic_0001>

<bundles_post_ra>
// kernel: tpu_custom_call.1
= control target key start
LH: loop header
LB: loop body
LE: loop exit
PB: predicated region body
PF: predicated region fallthrough
CT: control target
= control target key end

     0   :  { %8 = vsyncpa [#allocation5], 0  ;;  %s2077_s0 = inlined_call_operand.vmem [shape: f32[64,32], index: 0, kind: input, shape index: {}]   ;;  %s2078_s1 = inlined_call_operand.vmem [shape: f32[64,128], index: 1, kind: input, shape index: {}]   ;;  %s2079_s2 = inlined_call_operand.hbm [shape: f32[568,128], index: 2, kind: input, shape index: {}]   ;;  %s2080_s3 = inlined_call_operand.hbm [shape: f32[8,128], index: 3, kind: output, shape index: {}]  }
   0x1   :  { %9 = vsyncpa [#allocation6], 0  ;;  %s18_s14 = sshll.u32 %s2079_s2, 4  ;;  %s1424_s15 = smov [#allocation4]   ;;  %s19_s14 = int_to_ptr.hbm [resolvable:$true] %s18_s14 }
   0x2   :  { %s20_s16 = sshll.u32 %s1424_s15, 4  ;;  %s1425_s17 = smov 128   ;;  %s21_s16 = int_to_ptr.vmem [resolvable:$true] %s20_s16 }
   0x3   :  { %s1426_s18 = smov 8  }
   0x4   :  { %26 = dma.hbm_to_vmem [thread:$0]  %s19_s14, 9088, %s21_s16, [#allocation5], %s1425_s17, %s1425_s17, %s1426_s18  }
   0x5   :  { %1420 = dma.done.wait [#allocation5], 9088  }
   0x6   :  { %1421 = vsyncadd [#allocation5], 4294958208  ;;  %v1455_v0 = vld [vmem:[#allocation4 + $0x98] sm:$0xff]  ;;  %v1457_v1 = vld [vmem:[#allocation4 + $0x90] sm:$0xff]  ;;  %vm61_vm0 = vcmask 261120   ;;  %v1427_v21 = vmov 0.0  }
   0x7   :  { %136 = vmatpush.msra.mxu1 %v1455_v0  ;;  %195 = vmatpush.msra.mxu2 %v1455_v0  ;;  %v1461_v2 = vld [vmem:[#allocation4 + $0x88] sm:$0xff]  ;;  %v34_v3 = vld [vmem:[#allocation4 + $0x18] sm:$0xff]  ;;  %v1466_v4 = vld [vmem:[#allocation4 + $0x80] sm:$0xff]  ;;  %s1428_s20 = smov 96   ;;  %s1429_s21 = smov 64  }
   0x8   :  { %254 = vmatpush.msra.mxu3 %v1455_v0  ;;  %98 = vmatpush.msra.mxu0 %v34_v3  ;;  %v33_v5 = vld [vmem:[#allocation4 + $0x10] sm:$0xff]  ;;  %v32_v6 = vld [vmem:[#allocation4 + $0x8] sm:$0xff]  ;;  %v1471_v7 = vld [vmem:[#allocation4 + $0x78] sm:$0xff]  ;;  %s1430_s22 = smov 32   ;;  %s1196_s27 = sshll.u32 %s2080_s3, 4  ;;  %s1197_s27 = int_to_ptr.hbm [resolvable:$true] %s1196_s27 }
   0x9   :  { %137 = vmatpush.msra.mxu1 %v1457_v1  ;;  %196 = vmatpush.msra.mxu2 %v1457_v1  ;;  %v31_v8 = vld [vmem:[#allocation4] sm:$0xff]  ;;  %v1476_v9 = vld [vmem:[#allocation4 + $0x70] sm:$0xff]  ;;  %v1484_v11 = vld [vmem:[#allocation4 + $0x68] sm:$0xff] }
   0xa   :  { %255 = vmatpush.msra.mxu3 %v1457_v1  ;;  %99 = vmatpush.msra.mxu0 %v33_v5  ;;  %v52_v10 = vld [vmem:[%s2077_s0] sm:$0xff]  ;;  %v1495_v13 = vld [vmem:[#allocation4 + $0x58] sm:$0xff]  ;;  %v1501_v14 = vld [vmem:[#allocation4 + $0x50] sm:$0xff] }
   0xb   :  { %138 = vmatpush.msra.mxu1 %v1461_v2  ;;  %197 = vmatpush.msra.mxu2 %v1461_v2  ;;  %v1489_v12 = vld [vmem:[#allocation4 + $0x60] sm:$0xff]  ;;  %v1507_v15 = vld [vmem:[#allocation4 + $0x48] sm:$0xff]  ;;  %v1519_v17 = vld [vmem:[#allocation4 + $0x38] sm:$0xff] }
   0xc   :  { %256 = vmatpush.msra.mxu3 %v1461_v2  ;;  %100 = vmatpush.msra.mxu0 %v32_v6  ;;  %v1513_v16 = vld [vmem:[#allocation4 + $0x40] sm:$0xff]  ;;  %v1525_v18 = vld [vmem:[#allocation4 + $0x30] sm:$0xff]  ;;  %v1531_v19 = vld [vmem:[#allocation4 + $0x28] sm:$0xff] }
   0xd   :  { %139 = vmatpush.msra.mxu1 %v1466_v4  ;;  %198 = vmatpush.msra.mxu2 %v1466_v4  ;;  %v1537_v20 = vld [vmem:[#allocation4 + $0x20] sm:$0xff]  ;;  %v53_v40 = vld [vmem:[%s2077_s0 + $0x8] sm:$0xff]  ;;  %v54_v5 = vld [vmem:[%s2077_s0 + $0x10] sm:$0xff] }
   0xe   :  { %257 = vmatpush.msra.mxu3 %v1466_v4  ;;  %101 = vmatpush.msra.mxu0 %v31_v8  ;;  %v1620_v22 = vld [vmem:[#allocation4 + $0xa0] ss:$0 sm:$0xff] }
   0xf   :  { %140 = vmatpush.msra.mxu1 %v1471_v7  ;;  %199 = vmatpush.msra.mxu2 %v1471_v7  ;;  %v1633_v47 = vld [vmem:[%s2078_s1] sm:$0xff] }
  0x10   :  { %258 = vmatpush.msra.mxu3 %v1471_v7  ;;  %1206 = vmatmul.msk.f32.vlgmr.msra.gmra.mxu0 %vm61_vm0, %v52_v10  ;;  %vm189_vm5 = vcmp.ne.f32.partialorder %v1633_v47, 0.0 }
  0x11   :  { %141 = vmatpush.msra.mxu1 %v1476_v9  ;;  %200 = vmatpush.msra.mxu2 %v1476_v9 }
  0x12   :  { %259 = vmatpush.msra.mxu3 %v1476_v9  ;;  %490 = vmatpush.msrb.mxu0 %v1455_v0 }
  0x13   :  { %142 = vmatpush.msra.mxu1 %v1484_v11  ;;  %201 = vmatpush.msra.mxu2 %v1484_v11 }
  0x14   :  { %260 = vmatpush.msra.mxu3 %v1484_v11  ;;  %491 = vmatpush.msrb.mxu0 %v1457_v1 }
  0x15   :  { %143 = vmatpush.msra.mxu1 %v1489_v12  ;;  %202 = vmatpush.msra.mxu2 %v1489_v12 }
  0x16   :  { %261 = vmatpush.msra.mxu3 %v1489_v12  ;;  %492 = vmatpush.msrb.mxu0 %v1461_v2 }
  0x17   :  { %144 = vmatpush.msra.mxu1 %v1495_v13  ;;  %203 = vmatpush.msra.mxu2 %v1495_v13 }
  0x18   :  { %262 = vmatpush.msra.mxu3 %v1495_v13  ;;  %493 = vmatpush.msrb.mxu0 %v1466_v4 }
  0x19   :  { %145 = vmatpush.msra.mxu1 %v1501_v14  ;;  %204 = vmatpush.msra.mxu2 %v1501_v14 }
  0x1a   :  { %263 = vmatpush.msra.mxu3 %v1501_v14  ;;  %494 = vmatpush.msrb.mxu0 %v1471_v7 }
  0x1b   :  { %146 = vmatpush.msra.mxu1 %v1507_v15  ;;  %205 = vmatpush.msra.mxu2 %v1507_v15 }
  0x1c   :  { %264 = vmatpush.msra.mxu3 %v1507_v15  ;;  %495 = vmatpush.msrb.mxu0 %v1476_v9 }
  0x1d   :  { %147 = vmatpush.msra.mxu1 %v1513_v16  ;;  %206 = vmatpush.msra.mxu2 %v1513_v16 }
  0x1e   :  { %265 = vmatpush.msra.mxu3 %v1513_v16  ;;  %496 = vmatpush.msrb.mxu0 %v1484_v11 }
  0x1f   :  { %148 = vmatpush.msra.mxu1 %v1519_v17  ;;  %207 = vmatpush.msra.mxu2 %v1519_v17 }
  0x20   :  { %266 = vmatpush.msra.mxu3 %v1519_v17  ;;  %497 = vmatpush.msrb.mxu0 %v1489_v12 }
  0x21   :  { %149 = vmatpush.msra.mxu1 %v1525_v18  ;;  %208 = vmatpush.msra.mxu2 %v1525_v18 }
  0x22   :  { %267 = vmatpush.msra.mxu3 %v1525_v18  ;;  %498 = vmatpush.msrb.mxu0 %v1495_v13 }
  0x23   :  { %150 = vmatpush.msra.mxu1 %v1531_v19  ;;  %209 = vmatpush.msra.mxu2 %v1531_v19 }
  0x24   :  { %268 = vmatpush.msra.mxu3 %v1531_v19  ;;  %499 = vmatpush.msrb.mxu0 %v1501_v14 }
  0x25   :  { %151 = vmatpush.msra.mxu1 %v1537_v20  ;;  %210 = vmatpush.msra.mxu2 %v1537_v20 }
  0x26   :  { %152 = vmatmul.f32.vlgmr.msra.gmra.mxu1 %v1427_v21  ;;  %269 = vmatpush.msra.mxu3 %v1537_v20 }
  0x27   :  { %313 = vmatpush.msrb.mxu1 %v1455_v0  ;;  %372 = vmatpush.msrb.mxu2 %v1455_v0 }
  0x28   :  { %431 = vmatpush.msrb.mxu3 %v1455_v0  ;;  %500 = vmatpush.msrb.mxu0 %v1507_v15 }
  0x29   :  { %314 = vmatpush.msrb.mxu1 %v1457_v1  ;;  %373 = vmatpush.msrb.mxu2 %v1457_v1 }
  0x2a   :  { %432 = vmatpush.msrb.mxu3 %v1457_v1  ;;  %501 = vmatpush.msrb.mxu0 %v1513_v16 }
  0x2b   :  { %315 = vmatpush.msrb.mxu1 %v1461_v2  ;;  %374 = vmatpush.msrb.mxu2 %v1461_v2 }
  0x2c   :  { %433 = vmatpush.msrb.mxu3 %v1461_v2  ;;  %502 = vmatpush.msrb.mxu0 %v1519_v17 }
  0x2d   :  { %316 = vmatpush.msrb.mxu1 %v1466_v4  ;;  %375 = vmatpush.msrb.mxu2 %v1466_v4 }
  0x2e   :  { %434 = vmatpush.msrb.mxu3 %v1466_v4  ;;  %503 = vmatpush.msrb.mxu0 %v1525_v18 }
  0x2f   :  { %317 = vmatpush.msrb.mxu1 %v1471_v7  ;;  %376 = vmatpush.msrb.mxu2 %v1471_v7 }
  0x30   :  { %435 = vmatpush.msrb.mxu3 %v1471_v7  ;;  %504 = vmatpush.msrb.mxu0 %v1531_v19 }
  0x31   :  { %318 = vmatpush.msrb.mxu1 %v1476_v9  ;;  %377 = vmatpush.msrb.mxu2 %v1476_v9 }
  0x32   :  { %436 = vmatpush.msrb.mxu3 %v1476_v9  ;;  %505 = vmatpush.msrb.mxu0 %v1537_v20 }
  0x33   :  { %319 = vmatpush.msrb.mxu1 %v1484_v11  ;;  %378 = vmatpush.msrb.mxu2 %v1484_v11 }
  0x34   :  { %437 = vmatpush.msrb.mxu3 %v1484_v11  ;;  %1207 = vmatmul.msk.f32.gmra.mxu0 %vm61_vm0, %v53_v40  ;;  %v55_v40 = vld [vmem:[%s2077_s0 + $0x18] sm:$0xff] }
  0x35   :  { %320 = vmatpush.msrb.mxu1 %v1489_v12  ;;  %379 = vmatpush.msrb.mxu2 %v1489_v12 }
  0x36   :  { %438 = vmatpush.msrb.mxu3 %v1489_v12 }
  0x37   :  { %321 = vmatpush.msrb.mxu1 %v1495_v13  ;;  %380 = vmatpush.msrb.mxu2 %v1495_v13 }
  0x38   :  { %439 = vmatpush.msrb.mxu3 %v1495_v13 }
  0x39   :  { %322 = vmatpush.msrb.mxu1 %v1501_v14  ;;  %381 = vmatpush.msrb.mxu2 %v1501_v14 }
  0x3a   :  { %440 = vmatpush.msrb.mxu3 %v1501_v14 }
  0x3b   :  { %323 = vmatpush.msrb.mxu1 %v1507_v15  ;;  %382 = vmatpush.msrb.mxu2 %v1507_v15 }
  0x3c   :  { %441 = vmatpush.msrb.mxu3 %v1507_v15  ;;  %1208 = vmatmul.msk.f32.gmra.mxu0 %vm61_vm0, %v54_v5 }
  0x3d   :  { %324 = vmatpush.msrb.mxu1 %v1513_v16  ;;  %383 = vmatpush.msrb.mxu2 %v1513_v16 }
  0x3e   :  { %442 = vmatpush.msrb.mxu3 %v1513_v16 }
  0x3f   :  { %325 = vmatpush.msrb.mxu1 %v1519_v17  ;;  %384 = vmatpush.msrb.mxu2 %v1519_v17 }
  0x40   :  { %443 = vmatpush.msrb.mxu3 %v1519_v17 }
  0x41   :  { %326 = vmatpush.msrb.mxu1 %v1525_v18  ;;  %385 = vmatpush.msrb.mxu2 %v1525_v18 }
  0x42   :  { %444 = vmatpush.msrb.mxu3 %v1525_v18 }
  0x43   :  { %327 = vmatpush.msrb.mxu1 %v1531_v19  ;;  %386 = vmatpush.msrb.mxu2 %v1531_v19 }
  0x44   :  { %445 = vmatpush.msrb.mxu3 %v1531_v19  ;;  %1209 = vmatmul.msk.f32.gmra.mxu0 %vm61_vm0, %v55_v40 }
  0x45   :  { %328 = vmatpush.msrb.mxu1 %v1537_v20  ;;  %387 = vmatpush.msrb.mxu2 %v1537_v20 }
  0x46   :  { %446 = vmatpush.msrb.mxu3 %v1537_v20 }
  0x47   :  { %549 = vmatpush.msra.mxu1 %v1455_v0 }
  0x49   :  { %550 = vmatpush.msra.mxu1 %v1457_v1 }
  0x4b   :  { %551 = vmatpush.msra.mxu1 %v1461_v2 }
  0x4d   :  { %552 = vmatpush.msra.mxu1 %v1466_v4 }
  0x4f   :  { %553 = vmatpush.msra.mxu1 %v1471_v7  ;;  %v1652_v7 = vld [vmem:[%s2078_s1 + $0x8] sm:$0xff] }
  0x50   :  { %vm248_vm10 = vcmp.ne.f32.partialorder %v1652_v7, 0.0 }
  0x51   :  { %554 = vmatpush.msra.mxu1 %v1476_v9 }
  0x53   :  { %555 = vmatpush.msra.mxu1 %v1484_v11 }
  0x55   :  { %556 = vmatpush.msra.mxu1 %v1489_v12 }
  0x57   :  { %557 = vmatpush.msra.mxu1 %v1495_v13 }
  0x59   :  { %558 = vmatpush.msra.mxu1 %v1501_v14 }
  0x5b   :  { %559 = vmatpush.msra.mxu1 %v1507_v15 }
  0x5d   :  { %560 = vmatpush.msra.mxu1 %v1513_v16 }
  0x5f   :  { %561 = vmatpush.msra.mxu1 %v1519_v17 }
  0x61   :  { %562 = vmatpush.msra.mxu1 %v1525_v18 }
  0x63   :  { %563 = vmatpush.msra.mxu1 %v1531_v19 }
  0x65   :  { %564 = vmatpush.msra.mxu1 %v1537_v20 }
  0x8d   :  { %v103_v23 = vpop.f32.mrf.mxu0 }
  0x8e   :  { %v104_v24 = vadd.f32 %v1620_v22, %v103_v23 }
  0xa3   :  { %v153_v25 = vpop.f32.mrf.mxu1 }
  0xa4   :  { %v156_v26 = vadd.f32 %v153_v25, %v104_v24 }
  0xa6   :  { %v1214_v27 = vmul.f32 -1.442695, %v156_v26 }
  0xa8   :  { %1243 = vpow2.f32 %v1214_v27 }
  0xae   :  { %v1244_v28 = vpop.eup %1243 }
  0xaf   :  { %v160_v29 = vadd.f32 1.0, %v1244_v28 }
  0xb1   :  { %1245 = vrcp.f32 %v160_v29  ;;  %v172_v33 = vand.u32 2147483648, %v160_v29  ;;  %v170_v35 = vand.u32 2147483647, %v160_v29  ;;  %vm166_vm2 = vweird.f32 %v160_v29  ;;  %v106_v52 = vpop.f32.mrf.mxu0 }
  0xb2   :  { %1247 = vtanh.f32 %v156_v26  ;;  %v107_v53 = vadd.f32 %v1620_v22, %v106_v52 }
  0xb3   :  { %v173_v37 = vor.u32 1.1754944e-38, %v172_v33  ;;  %vm171_vm4 = vcmp.eq.f32.partialorder %v170_v35, 8.507059e+37 }
  0xb7   :  { %v1246_v30 = vpop.eup %1245 }
  0xb8   :  { %v162_v31 = vmul.f32 %v1246_v30, %v160_v29  ;;  %vm167_vm1 = vweird.f32 %v1246_v30  ;;  %v1248_v42 = vpop.eup %1247 }
  0xb9   :  { %vm168_vm3 = vmor %vm166_vm2, %vm167_vm1  ;;  %v109_v23 = vpop.f32.mrf.mxu0 }
  0xba   :  { %v163_v32 = vsub.f32 1.0, %v162_v31  ;;  %v110_v24 = vadd.f32 %v1620_v22, %v109_v23  ;;  %v609_v23 = vld [vmem:[#allocation4 + $0xd0] sm:$0xff] }
  0xbc   :  { %v164_v34 = vmul.f32 %v1246_v30, %v163_v32 }
  0xbe   :  { %v165_v36 = vadd.f32 %v1246_v30, %v164_v34 }
  0xc0   :  { %v169_v38 = vsel %vm168_vm3, %v1246_v30, %v165_v36 }
  0xc1   :  { %v174_v39 = vsel %vm171_vm4, %v173_v37, %v169_v38 }
  0xc2   :  { %181 = vrot.lane.b32.xlu1 %v174_v39, %s1428_s20  ;;  %177 = vrot.lane.b32.xlu0 %v174_v39, %s1429_s21 }
  0xca   :  { %179 = vrot.lane.b32.xlu0 %v174_v39, %s1430_s22 }
 0x134   :  { %v178_v41 = vpop.permute.xlu0 %177  ;;  %v182_v49 = vpop.permute.xlu1 %181 }
 0x135   :  { %v184_v44 = vmul.f32 %v1248_v42, %v178_v41  ;;  %v1677_v42 = vld [vmem:[%s2078_s1 + $0x10] sm:$0xff] }
 0x136   :  { %vm307_vm15 = vcmp.ne.f32.partialorder %v1677_v42, 0.0 }
 0x13c   :  { %v180_v43 = vpop.permute.xlu0 %179 }
 0x13d   :  { %v183_v45 = vmul.f32 0.0, %v180_v43 }
 0x13f   :  { %v185_v46 = vadd.f32 %v184_v44, %v183_v45 }
 0x141   :  { %1249 = vtanh.f32 %v185_v46  ;;  %v191_v9 = vsel %vm189_vm5, %v185_v46, 0.0 }
 0x147   :  { %v1250_v48 = vpop.eup %1249 }
 0x148   :  { %v187_v50 = vmul.f32 %v1250_v48, %v182_v49 }
 0x14a   :  { %v1637_v51 = vmul.f32 %v1633_v47, %v187_v50  ;;  %1215 = vmatmul.msk.f32.vlgmr.msra.gmra.mxu2 %vm189_vm5, %v187_v50  ;;  %v190_v18 = vsel %vm189_vm5, %v187_v50, 0.0  ;;  %v1371_v47 = vld [vmem:[#allocation4 + $0xa0] ss:$0 sm:$0xff] }
 0x1cd   :  { %v212_v54 = vpop.f32.mrf.mxu2 }
 0x1ce   :  { %v215_v55 = vadd.f32 %v212_v54, %v107_v53 }
 0x1d0   :  { %v1216_v56 = vmul.f32 -1.442695, %v215_v55 }
 0x1d2   :  { %1251 = vpow2.f32 %v1216_v56  ;;  %v112_v56 = vpop.f32.mrf.mxu0 }
 0x1d8   :  { %v1252_v57 = vpop.eup %1251 }
 0x1d9   :  { %v219_v58 = vadd.f32 1.0, %v1252_v57  ;;  %v113_v57 = vadd.f32 %v1620_v22, %v112_v56 }
 0x1db   :  { %1253 = vrcp.f32 %v219_v58  ;;  %v231_v62 = vand.u32 2147483648, %v219_v58  ;;  %v229_v0 = vand.u32 2147483647, %v219_v58  ;;  %vm225_vm7 = vweird.f32 %v219_v58 }
 0x1dc   :  { %1255 = vtanh.f32 %v215_v55 }
 0x1dd   :  { %v232_v2 = vor.u32 1.1754944e-38, %v231_v62  ;;  %vm230_vm9 = vcmp.eq.f32.partialorder %v229_v0, 8.507059e+37 }
 0x1e1   :  { %v1254_v59 = vpop.eup %1253 }
 0x1e2   :  { %v221_v60 = vmul.f32 %v1254_v59, %v219_v58  ;;  %vm226_vm6 = vweird.f32 %v1254_v59  ;;  %v1256_v8 = vpop.eup %1255 }
 0x1e3   :  { %vm227_vm8 = vmor %vm225_vm7, %vm226_vm6 }
 0x1e4   :  { %v222_v61 = vsub.f32 1.0, %v221_v60 }
 0x1e6   :  { %v223_v63 = vmul.f32 %v1254_v59, %v222_v61 }
 0x1e8   :  { %v224_v1 = vadd.f32 %v1254_v59, %v223_v63 }
 0x1ea   :  { %v228_v3 = vsel %vm227_vm8, %v1254_v59, %v224_v1 }
 0x1eb   :  { %v233_v4 = vsel %vm230_vm9, %v232_v2, %v228_v3 }
 0x1ec   :  { %238 = vrot.lane.b32.xlu2 %v233_v4, %s1430_s22  ;;  %236 = vrot.lane.b32.xlu1 %v233_v4, %s1429_s21 }
 0x1f4   :  { %240 = vrot.lane.b32.xlu2 %v233_v4, %s1428_s20 }
 0x246   :  { %v239_v6 = vpop.permute.xlu2 %238 }
 0x247   :  { %v242_v11 = vmul.f32 %v239_v6, %v191_v9 }
 0x24e   :  { %v241_v16 = vpop.permute.xlu2 %240 }
 0x25e   :  { %v237_v10 = vpop.permute.xlu1 %236 }
 0x25f   :  { %v243_v12 = vmul.f32 %v1256_v8, %v237_v10  ;;  %v619_v10 = vld [vmem:[#allocation4 + $0x120] sm:$0xff] }
 0x260   :  { %646 = vmatpush.msra.mxu2 %v619_v10  ;;  %v1799_v10 = vld [vmem:[#allocation4 + $0x140] sm:$0xff] }
 0x261   :  { %v244_v13 = vadd.f32 %v243_v12, %v242_v11  ;;  %v618_v11 = vld [vmem:[#allocation4 + $0x118] sm:$0xff]  ;;  %v617_v12 = vld [vmem:[#allocation4 + $0x110] sm:$0xff] }
 0x262   :  { %647 = vmatpush.msra.mxu2 %v618_v11  ;;  %v1804_v11 = vld [vmem:[#allocation4 + $0x138] sm:$0xff] }
 0x263   :  { %1257 = vtanh.f32 %v244_v13  ;;  %v250_v14 = vsel %vm248_vm10, %v244_v13, %v191_v9  ;;  %v616_v13 = vld [vmem:[#allocation4 + $0x108] sm:$0xff] }
 0x264   :  { %648 = vmatpush.msra.mxu2 %v617_v12  ;;  %v57_v12 = vld [vmem:[%s2077_s0 + $0x28] sm:$0xff] }
 0x266   :  { %649 = vmatpush.msra.mxu2 %v616_v13  ;;  %v1811_v13 = vld [vmem:[#allocation4 + $0x130] sm:$0xff] }
 0x269   :  { %v1258_v15 = vpop.eup %1257 }
 0x26a   :  { %v246_v17 = vmul.f32 %v1258_v15, %v241_v16  ;;  %v614_v15 = vld [vmem:[#allocation4 + $0xf8] sm:$0xff]  ;;  %v613_v16 = vld [vmem:[#allocation4 + $0xf0] sm:$0xff] }
 0x26c   :  { %v249_v19 = vsel %vm248_vm10, %v246_v17, %v190_v18  ;;  %v1664_v20 = vmul.f32 %v1652_v7, %v246_v17  ;;  %v612_v17 = vld [vmem:[#allocation4 + $0xe8] sm:$0xff]  ;;  %v611_v18 = vld [vmem:[#allocation4 + $0xe0] sm:$0xff] }
 0x26d   :  { %270 = vmatmul.f32.vlgmr.msra.gmra.mxu3 %v249_v19 }
 0x2f0   :  { %v271_v25 = vpop.f32.mrf.mxu3 }
 0x2f1   :  { %v274_v26 = vadd.f32 %v271_v25, %v110_v24  ;;  %v608_v24 = vld [vmem:[#allocation4 + $0xc8] sm:$0xff]  ;;  %v607_v25 = vld [vmem:[#allocation4 + $0xc0] sm:$0xff] }
 0x2f3   :  { %v1217_v27 = vmul.f32 -1.442695, %v274_v26 }
 0x2f5   :  { %1259 = vpow2.f32 %v1217_v27  ;;  %v56_v27 = vld [vmem:[%s2077_s0 + $0x20] sm:$0xff] }
 0x2f6   :  { %1210 = vmatmul.msk.f32.gmra.mxu0 %vm61_vm0, %v56_v27 }
 0x2fb   :  { %v1260_v28 = vpop.eup %1259 }
 0x2fc   :  { %v278_v29 = vadd.f32 1.0, %v1260_v28  ;;  %v605_v28 = vld [vmem:[#allocation4 + $0xb0] sm:$0xff] }
 0x2fe   :  { %1261 = vrcp.f32 %v278_v29  ;;  %v290_v33 = vand.u32 2147483648, %v278_v29  ;;  %v288_v35 = vand.u32 2147483647, %v278_v29  ;;  %vm284_vm12 = vweird.f32 %v278_v29  ;;  %1211 = vmatmul.msk.f32.gmra.mxu0 %vm61_vm0, %v57_v12 }
 0x2ff   :  { %1263 = vtanh.f32 %v274_v26  ;;  %v606_v26 = vld [vmem:[#allocation4 + $0xb8] sm:$0xff] }
 0x300   :  { %v291_v37 = vor.u32 1.1754944e-38, %v290_v33  ;;  %vm289_vm14 = vcmp.eq.f32.partialorder %v288_v35, 8.507059e+37 }
 0x304   :  { %v1262_v30 = vpop.eup %1261 }
 0x305   :  { %v280_v31 = vmul.f32 %v1262_v30, %v278_v29  ;;  %vm285_vm11 = vweird.f32 %v1262_v30  ;;  %v1264_v43 = vpop.eup %1263  ;;  %v604_v29 = vld [vmem:[#allocation4 + $0xa8] sm:$0xff] }
 0x306   :  { %vm286_vm13 = vmor %vm284_vm12, %vm285_vm11 }
 0x307   :  { %v281_v32 = vsub.f32 1.0, %v280_v31  ;;  %v1703_v31 = vld [vmem:[%s2078_s1 + $0x18] sm:$0xff] }
 0x308   :  { %vm366_vm6 = vcmp.ne.f32.partialorder %v1703_v31, 0.0 }
 0x309   :  { %v282_v34 = vmul.f32 %v1262_v30, %v281_v32 }
 0x30b   :  { %v283_v36 = vadd.f32 %v1262_v30, %v282_v34 }
 0x30d   :  { %v287_v38 = vsel %vm286_vm13, %v1262_v30, %v283_v36 }
 0x30e   :  { %v292_v39 = vsel %vm289_vm14, %v291_v37, %v287_v38 }
 0x30f   :  { %299 = vrot.lane.b32.xlu2 %v292_v39, %s1428_s20  ;;  %297 = vrot.lane.b32.xlu1 %v292_v39, %s1430_s22 }
 0x310   :  { %295 = vrot.lane.b32.xlu0 %v292_v39, %s1429_s21 }
 0x369   :  { %v300_v52 = vpop.permute.xlu2 %299 }
 0x381   :  { %v298_v41 = vpop.permute.xlu1 %297 }
 0x382   :  { %v301_v44 = vmul.f32 %v298_v41, %v250_v14  ;;  %v296_v45 = vpop.permute.xlu0 %295 }
 0x383   :  { %v302_v46 = vmul.f32 %v1264_v43, %v296_v45 }
 0x385   :  { %v303_v48 = vadd.f32 %v302_v46, %v301_v44  ;;  %v115_v44 = vpop.f32.mrf.mxu0 }
 0x386   :  { %v116_v45 = vadd.f32 %v1620_v22, %v115_v44 }
 0x387   :  { %1265 = vtanh.f32 %v303_v48  ;;  %v1682_v49 = vsel %vm307_vm15, %v303_v48, %v250_v14  ;;  %v615_v14 = vld [vmem:[#allocation4 + $0x100] sm:$0xff] }
 0x388   :  { %650 = vmatpush.msra.mxu2 %v615_v14  ;;  %v1816_v14 = vld [vmem:[#allocation4 + $0x128] sm:$0xff] }
 0x38a   :  { %651 = vmatpush.msra.mxu2 %v614_v15 }
 0x38c   :  { %652 = vmatpush.msra.mxu2 %v613_v16  ;;  %v1833_v16 = vld [vmem:[%s2078_s1 + $0x20] sm:$0xff] }
 0x38d   :  { %v1266_v50 = vpop.eup %1265  ;;  %vm425_vm12 = vcmp.ne.f32.partialorder %v1833_v16, 0.0 }
 0x38e   :  { %v305_v53 = vmul.f32 %v1266_v50, %v300_v52  ;;  %653 = vmatpush.msra.mxu2 %v612_v17 }
 0x390   :  { %v1686_v54 = vsel %vm307_vm15, %v305_v53, %v249_v19  ;;  %v1689_v55 = vmul.f32 %v1677_v42, %v305_v53  ;;  %v610_v19 = vld [vmem:[#allocation4 + $0xd8] sm:$0xff]  ;;  %654 = vmatpush.msra.mxu2 %v611_v18 }
 0x391   :  { %329 = vmatmul.f32.vlgmr.msrb.gmra.mxu1 %v1686_v54 }
 0x392   :  { %655 = vmatpush.msra.mxu2 %v610_v19 }
 0x394   :  { %656 = vmatpush.msra.mxu2 %v609_v23 }
 0x396   :  { %657 = vmatpush.msra.mxu2 %v608_v24 }
 0x398   :  { %658 = vmatpush.msra.mxu2 %v607_v25 }
 0x39a   :  { %659 = vmatpush.msra.mxu2 %v606_v26 }
 0x39c   :  { %660 = vmatpush.msra.mxu2 %v605_v28 }
 0x39e   :  { %661 = vmatpush.msra.mxu2 %v604_v29 }
 0x40e   :  { %v330_v58 = vpop.f32.mrf.mxu1 }
 0x40f   :  { %v333_v59 = vadd.f32 %v330_v58, %v113_v57 }
 0x411   :  { %v1218_v60 = vmul.f32 -1.442695, %v333_v59 }
 0x413   :  { %1267 = vpow2.f32 %v1218_v60 }
 0x419   :  { %v1268_v61 = vpop.eup %1267 }
 0x41a   :  { %v337_v62 = vadd.f32 1.0, %v1268_v61  ;;  %v1729_v61 = vld [vmem:[#allocation4 + $0x1a0] sm:$0xff] }
 0x41b   :  { %696 = vmatpush.msra.mxu3 %v1729_v61  ;;  %753 = vmatpush.msra.mxu0 %v1729_v61 }
 0x41c   :  { %1269 = vrcp.f32 %v337_v62  ;;  %v349_v2 = vand.u32 2147483648, %v337_v62  ;;  %v347_v4 = vand.u32 2147483647, %v337_v62  ;;  %vm343_vm2 = vweird.f32 %v337_v62  ;;  %810 = vmatpush.msrb.mxu1 %v1729_v61 }
 0x41d   :  { %1271 = vtanh.f32 %v333_v59 }
 0x41e   :  { %v350_v6 = vor.u32 1.1754944e-38, %v349_v2  ;;  %vm348_vm4 = vcmp.eq.f32.partialorder %v347_v4, 8.507059e+37  ;;  %v1759_v2 = vld [vmem:[#allocation4 + $0x178] sm:$0xff]  ;;  %v1769_v4 = vld [vmem:[#allocation4 + $0x168] sm:$0xff] }
 0x422   :  { %v1270_v63 = vpop.eup %1269 }
 0x423   :  { %v339_v0 = vmul.f32 %v1270_v63, %v337_v62  ;;  %vm344_vm1 = vweird.f32 %v1270_v63  ;;  %v1272_v32 = vpop.eup %1271  ;;  %v1731_v62 = vld [vmem:[#allocation4 + $0x198] sm:$0xff] }
 0x424   :  { %vm345_vm3 = vmor %vm343_vm2, %vm344_vm1  ;;  %697 = vmatpush.msra.mxu3 %v1731_v62  ;;  %754 = vmatpush.msra.mxu0 %v1731_v62 }
 0x425   :  { %v340_v1 = vsub.f32 1.0, %v339_v0  ;;  %v1741_v0 = vld [vmem:[#allocation4 + $0x188] sm:$0xff]  ;;  %811 = vmatpush.msrb.mxu1 %v1731_v62 }
 0x427   :  { %v341_v3 = vmul.f32 %v1270_v63, %v340_v1  ;;  %v1747_v1 = vld [vmem:[#allocation4 + $0x180] sm:$0xff] }
 0x429   :  { %v342_v5 = vadd.f32 %v1270_v63, %v341_v3  ;;  %v1763_v3 = vld [vmem:[#allocation4 + $0x170] sm:$0xff] }
 0x42b   :  { %v346_v8 = vsel %vm345_vm3, %v1270_v63, %v342_v5  ;;  %v1735_v63 = vld [vmem:[#allocation4 + $0x190] sm:$0xff]  ;;  %v1771_v5 = vld [vmem:[#allocation4 + $0x160] sm:$0xff] }
 0x42c   :  { %v351_v9 = vsel %vm348_vm4, %v350_v6, %v346_v8  ;;  %698 = vmatpush.msra.mxu3 %v1735_v63  ;;  %755 = vmatpush.msra.mxu0 %v1735_v63  ;;  %v1777_v6 = vld [vmem:[#allocation4 + $0x158] sm:$0xff]  ;;  %v1783_v8 = vld [vmem:[#allocation4 + $0x150] sm:$0xff] }
 0x42d   :  { %358 = vrot.lane.b32.xlu2 %v351_v9, %s1428_s20  ;;  %356 = vrot.lane.b32.xlu1 %v351_v9, %s1430_s22 }
 0x42e   :  { %354 = vrot.lane.b32.xlu0 %v351_v9, %s1429_s21  ;;  %812 = vmatpush.msrb.mxu1 %v1735_v63  ;;  %v1789_v9 = vld [vmem:[#allocation4 + $0x148] sm:$0xff] }
 0x42f   :  { %699 = vmatpush.msra.mxu3 %v1741_v0  ;;  %756 = vmatpush.msra.mxu0 %v1741_v0 }
 0x430   :  { %813 = vmatpush.msrb.mxu1 %v1741_v0 }
 0x431   :  { %700 = vmatpush.msra.mxu3 %v1747_v1  ;;  %757 = vmatpush.msra.mxu0 %v1747_v1 }
 0x432   :  { %814 = vmatpush.msrb.mxu1 %v1747_v1 }
 0x433   :  { %701 = vmatpush.msra.mxu3 %v1759_v2  ;;  %758 = vmatpush.msra.mxu0 %v1759_v2 }
 0x434   :  { %815 = vmatpush.msrb.mxu1 %v1759_v2 }
 0x435   :  { %702 = vmatpush.msra.mxu3 %v1763_v3  ;;  %759 = vmatpush.msra.mxu0 %v1763_v3 }
 0x436   :  { %816 = vmatpush.msrb.mxu1 %v1763_v3 }
 0x437   :  { %703 = vmatpush.msra.mxu3 %v1769_v4  ;;  %760 = vmatpush.msra.mxu0 %v1769_v4 }
 0x438   :  { %817 = vmatpush.msrb.mxu1 %v1769_v4 }
 0x439   :  { %704 = vmatpush.msra.mxu3 %v1771_v5  ;;  %761 = vmatpush.msra.mxu0 %v1771_v5 }
 0x43a   :  { %818 = vmatpush.msrb.mxu1 %v1771_v5 }
 0x43b   :  { %705 = vmatpush.msra.mxu3 %v1777_v6  ;;  %762 = vmatpush.msra.mxu0 %v1777_v6 }
 0x43c   :  { %819 = vmatpush.msrb.mxu1 %v1777_v6 }
 0x43d   :  { %706 = vmatpush.msra.mxu3 %v1783_v8  ;;  %763 = vmatpush.msra.mxu0 %v1783_v8 }
 0x43e   :  { %820 = vmatpush.msrb.mxu1 %v1783_v8 }
 0x43f   :  { %707 = vmatpush.msra.mxu3 %v1789_v9  ;;  %764 = vmatpush.msra.mxu0 %v1789_v9 }
 0x440   :  { %821 = vmatpush.msrb.mxu1 %v1789_v9 }
 0x441   :  { %708 = vmatpush.msra.mxu3 %v1799_v10  ;;  %765 = vmatpush.msra.mxu0 %v1799_v10 }
 0x442   :  { %822 = vmatpush.msrb.mxu1 %v1799_v10 }
 0x443   :  { %709 = vmatpush.msra.mxu3 %v1804_v11  ;;  %766 = vmatpush.msra.mxu0 %v1804_v11 }
 0x444   :  { %823 = vmatpush.msrb.mxu1 %v1804_v11 }
 0x445   :  { %710 = vmatpush.msra.mxu3 %v1811_v13  ;;  %767 = vmatpush.msra.mxu0 %v1811_v13 }
 0x446   :  { %824 = vmatpush.msrb.mxu1 %v1811_v13 }
 0x447   :  { %711 = vmatpush.msra.mxu3 %v1816_v14  ;;  %768 = vmatpush.msra.mxu0 %v1816_v14 }
 0x448   :  { %825 = vmatpush.msrb.mxu1 %v1816_v14 }
 0x487   :  { %v359_v39 = vpop.permute.xlu2 %358 }
 0x49f   :  { %v357_v30 = vpop.permute.xlu1 %356 }
 0x4a0   :  { %v360_v33 = vmul.f32 %v357_v30, %v1682_v49  ;;  %v355_v34 = vpop.permute.xlu0 %354 }
 0x4a1   :  { %v361_v35 = vmul.f32 %v1272_v32, %v355_v34 }
 0x4a3   :  { %v362_v36 = vadd.f32 %v361_v35, %v360_v33  ;;  %v1883_v35 = vld [vmem:[#allocation4 + $0x1a8] ss:$0 sm:$0xff] }
 0x4a5   :  { %1273 = vtanh.f32 %v362_v36  ;;  %v1710_v37 = vsel %vm366_vm6, %v362_v36, %v1682_v49 }
 0x4ab   :  { %v1274_v38 = vpop.eup %1273 }
 0x4ac   :  { %v364_v40 = vmul.f32 %v1274_v38, %v359_v39 }
 0x4ae   :  { %v1715_v41 = vsel %vm366_vm6, %v364_v40, %v1686_v54  ;;  %v369_v43 = vmul.f32 %v1703_v31, %v364_v40 }
 0x4af   :  { %388 = vmatmul.f32.vlgmr.msrb.gmra.mxu2 %v1715_v41 }
 0x4b0   :  { %1038 = vmatpush.msrb.mxu2 %v1729_v61 }
 0x4b2   :  { %1039 = vmatpush.msrb.mxu2 %v1731_v62 }
 0x4b4   :  { %1040 = vmatpush.msrb.mxu2 %v1735_v63 }
 0x4b6   :  { %1041 = vmatpush.msrb.mxu2 %v1741_v0 }
 0x4b7   :  { %662 = vmatmul.f32.vlgmr.msra.gmra.mxu2 %v1637_v51 }
 0x4b8   :  { %1042 = vmatpush.msrb.mxu2 %v1747_v1 }
 0x4ba   :  { %1043 = vmatpush.msrb.mxu2 %v1759_v2 }
 0x4bc   :  { %1044 = vmatpush.msrb.mxu2 %v1763_v3 }
 0x4be   :  { %1045 = vmatpush.msrb.mxu2 %v1769_v4 }
 0x4bf   :  { %665 = vmatmul.f32.gmra.mxu2 %v1664_v20 }
 0x4c0   :  { %1046 = vmatpush.msrb.mxu2 %v1771_v5 }
 0x4c2   :  { %1047 = vmatpush.msrb.mxu2 %v1777_v6 }
 0x4c4   :  { %1048 = vmatpush.msrb.mxu2 %v1783_v8 }
 0x4c6   :  { %1049 = vmatpush.msrb.mxu2 %v1789_v9 }
 0x4c7   :  { %668 = vmatmul.f32.gmra.mxu2 %v1689_v55 }
 0x4c8   :  { %1050 = vmatpush.msrb.mxu2 %v1799_v10 }
 0x4ca   :  { %1051 = vmatpush.msrb.mxu2 %v1804_v11 }
 0x4cc   :  { %1052 = vmatpush.msrb.mxu2 %v1811_v13 }
 0x4ce   :  { %1053 = vmatpush.msrb.mxu2 %v1816_v14 }
 0x4cf   :  { %671 = vmatmul.f32.gmra.mxu2 %v369_v43 }
 0x532   :  { %v389_v46 = vpop.f32.mrf.mxu2 }
 0x533   :  { %v1723_v48 = vadd.f32 %v389_v46, %v116_v45 }
 0x535   :  { %v1219_v49 = vmul.f32 -1.442695, %v1723_v48 }
 0x537   :  { %1275 = vpow2.f32 %v1219_v49 }
 0x53d   :  { %v1276_v50 = vpop.eup %1275 }
 0x53e   :  { %v396_v52 = vadd.f32 1.0, %v1276_v50 }
 0x540   :  { %1277 = vrcp.f32 %v396_v52  ;;  %v408_v54 = vand.u32 2147483648, %v396_v52  ;;  %v406_v56 = vand.u32 2147483647, %v396_v52  ;;  %vm402_vm8 = vweird.f32 %v396_v52 }
 0x541   :  { %1279 = vtanh.f32 %v1723_v48 }
 0x542   :  { %v409_v58 = vor.u32 1.1754944e-38, %v408_v54  ;;  %vm407_vm11 = vcmp.eq.f32.partialorder %v406_v56, 8.507059e+37 }
 0x546   :  { %v1278_v51 = vpop.eup %1277 }
 0x547   :  { %v398_v53 = vmul.f32 %v1278_v51, %v396_v52  ;;  %vm403_vm7 = vweird.f32 %v1278_v51  ;;  %v1280_v17 = vpop.eup %1279 }
 0x548   :  { %vm404_vm9 = vmor %vm402_vm8, %vm403_vm7 }
 0x549   :  { %v399_v20 = vsub.f32 1.0, %v398_v53 }
 0x54b   :  { %v400_v55 = vmul.f32 %v1278_v51, %v399_v20 }
 0x54d   :  { %v401_v57 = vadd.f32 %v1278_v51, %v400_v55 }
 0x54f   :  { %v405_v59 = vsel %vm404_vm9, %v1278_v51, %v401_v57 }
 0x550   :  { %v410_v60 = vsel %vm407_vm11, %v409_v58, %v405_v59 }
 0x551   :  { %417 = vrot.lane.b32.xlu2 %v410_v60, %s1428_s20  ;;  %415 = vrot.lane.b32.xlu1 %v410_v60, %s1430_s22 }
 0x552   :  { %413 = vrot.lane.b32.xlu0 %v410_v60, %s1429_s21 }
 0x5ab   :  { %v418_v27 = vpop.permute.xlu2 %417 }
 0x5c3   :  { %v416_v15 = vpop.permute.xlu1 %415 }
 0x5c4   :  { %v419_v18 = vmul.f32 %v416_v15, %v1710_v37  ;;  %v414_v19 = vpop.permute.xlu0 %413 }
 0x5c5   :  { %v420_v23 = vmul.f32 %v1280_v17, %v414_v19 }
 0x5c7   :  { %v421_v24 = vadd.f32 %v420_v23, %v419_v18 }
 0x5c9   :  { %1281 = vtanh.f32 %v421_v24  ;;  %v1840_v25 = vsel %vm425_vm12, %v421_v24, %v1710_v37  ;;  %v663_v37 = vpop.f32.mrf.mxu2  ;;  %v58_v24 = vld [vmem:[%s2077_s0 + $0x30] sm:$0xff] }
 0x5ca   :  { %v664_v38 = vadd.f32 %v1883_v35, %v663_v37  ;;  %1212 = vmatmul.msk.f32.gmra.mxu0 %vm61_vm0, %v58_v24 }
 0x5cf   :  { %v1282_v26 = vpop.eup %1281 }
 0x5d0   :  { %v423_v28 = vmul.f32 %v1282_v26, %v418_v27  ;;  %v59_v26 = vld [vmem:[%s2077_s0 + $0x38] sm:$0xff]  ;;  %v1903_v27 = vld [vmem:[%s2078_s1 + $0x28] sm:$0xff] }
 0x5d1   :  { %vm484_vm9 = vcmp.ne.f32.partialorder %v1903_v27, 0.0 }
 0x5d2   :  { %v1845_v29 = vsel %vm425_vm12, %v423_v28, %v1715_v41  ;;  %v428_v30 = vmul.f32 %v1833_v16, %v423_v28  ;;  %1213 = vmatmul.msk.f32.gmra.mxu0 %vm61_vm0, %v59_v26 }
 0x5d3   :  { %447 = vmatmul.f32.vlgmr.msrb.gmra.mxu3 %v1845_v29 }
 0x5d4   :  { %674 = vmatmul.f32.gmra.mxu2 %v428_v30  ;;  %867 = vmatpush.msrb.mxu3 %v1729_v61 }
 0x5d6   :  { %868 = vmatpush.msrb.mxu3 %v1731_v62 }
 0x5d8   :  { %869 = vmatpush.msrb.mxu3 %v1735_v63 }
 0x5da   :  { %870 = vmatpush.msrb.mxu3 %v1741_v0 }
 0x5db   :  { %712 = vmatmul.f32.vlgmr.msra.gmra.mxu3 %v1427_v21  ;;  %v118_v21 = vpop.f32.mrf.mxu0 }
 0x5dc   :  { %871 = vmatpush.msrb.mxu3 %v1747_v1  ;;  %v119_v32 = vadd.f32 %v1620_v22, %v118_v21 }
 0x5de   :  { %872 = vmatpush.msrb.mxu3 %v1759_v2 }
 0x5e0   :  { %873 = vmatpush.msrb.mxu3 %v1763_v3 }
 0x5e2   :  { %874 = vmatpush.msrb.mxu3 %v1769_v4 }
 0x5e4   :  { %875 = vmatpush.msrb.mxu3 %v1771_v5 }
 0x5e6   :  { %876 = vmatpush.msrb.mxu3 %v1777_v6 }
 0x5e8   :  { %877 = vmatpush.msrb.mxu3 %v1783_v8 }
 0x5ea   :  { %878 = vmatpush.msrb.mxu3 %v1789_v9 }
 0x5ec   :  { %879 = vmatpush.msrb.mxu3 %v1799_v10 }
 0x5ee   :  { %880 = vmatpush.msrb.mxu3 %v1804_v11 }
 0x5f0   :  { %881 = vmatpush.msrb.mxu3 %v1811_v13 }
 0x5f2   :  { %882 = vmatpush.msrb.mxu3 %v1816_v14 }
 0x5f4   :  { %1095 = vmatpush.msra.mxu3 %v1729_v61 }
 0x5f6   :  { %1096 = vmatpush.msra.mxu3 %v1731_v62 }
 0x5f8   :  { %1097 = vmatpush.msra.mxu3 %v1735_v63 }
 0x5fa   :  { %1098 = vmatpush.msra.mxu3 %v1741_v0 }
 0x5fc   :  { %1099 = vmatpush.msra.mxu3 %v1747_v1 }
 0x5fe   :  { %1100 = vmatpush.msra.mxu3 %v1759_v2 }
 0x600   :  { %1101 = vmatpush.msra.mxu3 %v1763_v3 }
 0x602   :  { %1102 = vmatpush.msra.mxu3 %v1769_v4 }
 0x604   :  { %1103 = vmatpush.msra.mxu3 %v1771_v5 }
 0x606   :  { %1104 = vmatpush.msra.mxu3 %v1777_v6 }
 0x608   :  { %1105 = vmatpush.msra.mxu3 %v1783_v8 }
 0x60a   :  { %1106 = vmatpush.msra.mxu3 %v1789_v9 }
 0x60c   :  { %1107 = vmatpush.msra.mxu3 %v1799_v10 }
 0x60e   :  { %1108 = vmatpush.msra.mxu3 %v1804_v11 }
 0x610   :  { %1109 = vmatpush.msra.mxu3 %v1811_v13 }
 0x612   :  { %1110 = vmatpush.msra.mxu3 %v1816_v14 }
 0x656   :  { %v448_v33 = vpop.f32.mrf.mxu3 }
 0x657   :  { %v451_v34 = vadd.f32 %v448_v33, %v119_v32 }
 0x659   :  { %v1220_v36 = vmul.f32 -1.442695, %v451_v34 }
 0x65b   :  { %1283 = vpow2.f32 %v1220_v36 }
 0x65e   :  { %v713_v39 = vpop.f32.mrf.mxu3 }
 0x65f   :  { %v716_v40 = vadd.f32 %v713_v39, %v664_v38 }
 0x661   :  { %v1284_v41 = vpop.eup %1283  ;;  %v1223_v43 = vmul.f32 -1.442695, %v716_v40 }
 0x662   :  { %v455_v44 = vadd.f32 1.0, %v1284_v41 }
 0x663   :  { %1285 = vpow2.f32 %v1223_v43 }
 0x664   :  { %1287 = vrcp.f32 %v455_v44  ;;  %v467_v52 = vand.u32 2147483648, %v455_v44  ;;  %v465_v53 = vand.u32 2147483647, %v455_v44  ;;  %vm461_vm14 = vweird.f32 %v455_v44 }
 0x666   :  { %v468_v55 = vor.u32 1.1754944e-38, %v467_v52  ;;  %vm466_vm2 = vcmp.eq.f32.partialorder %v465_v53, 8.507059e+37 }
 0x669   :  { %v1286_v45 = vpop.eup %1285 }
 0x66a   :  { %v1288_v46 = vpop.eup %1287  ;;  %v720_v48 = vadd.f32 1.0, %v1286_v45 }
 0x66b   :  { %v457_v49 = vmul.f32 %v1288_v46, %v455_v44  ;;  %vm462_vm13 = vweird.f32 %v1288_v46 }
 0x66c   :  { %1289 = vrcp.f32 %v720_v48  ;;  %vm463_vm1 = vmor %vm461_vm14, %vm462_vm13  ;;  %v732_v60 = vand.u32 2147483648, %v720_v48  ;;  %v730_v15 = vand.u32 2147483647, %v720_v48  ;;  %vm726_vm4 = vweird.f32 %v720_v48 }
 0x66d   :  { %v458_v50 = vsub.f32 1.0, %v457_v49  ;;  %1291 = vtanh.f32 %v451_v34 }
 0x66e   :  { %v733_v18 = vor.u32 1.1754944e-38, %v732_v60  ;;  %vm731_vm8 = vcmp.eq.f32.partialorder %v730_v15, 8.507059e+37  ;;  %1293 = vtanh.f32 %v716_v40 }
 0x66f   :  { %v459_v51 = vmul.f32 %v1288_v46, %v458_v50 }
 0x671   :  { %v460_v20 = vadd.f32 %v1288_v46, %v459_v51 }
 0x672   :  { %v1290_v54 = vpop.eup %1289 }
 0x673   :  { %v464_v56 = vsel %vm463_vm1, %v1288_v46, %v460_v20  ;;  %v722_v57 = vmul.f32 %v1290_v54, %v720_v48  ;;  %vm727_vm3 = vweird.f32 %v1290_v54  ;;  %v1292_v28 = vpop.eup %1291 }
 0x674   :  { %v469_v58 = vsel %vm466_vm2, %v468_v55, %v464_v56  ;;  %vm728_vm7 = vmor %vm726_vm4, %vm727_vm3  ;;  %v1294_v38 = vpop.eup %1293  ;;  %v666_v56 = vpop.f32.mrf.mxu2 }
 0x675   :  { %474 = vrot.lane.b32.xlu1 %v469_v58, %s1430_s22  ;;  %472 = vrot.lane.b32.xlu0 %v469_v58, %s1429_s21  ;;  %v723_v59 = vsub.f32 1.0, %v722_v57  ;;  %v667_v57 = vadd.f32 %v1883_v35, %v666_v56 }
 0x677   :  { %v724_v12 = vmul.f32 %v1290_v54, %v723_v59 }
 0x679   :  { %v725_v17 = vadd.f32 %v1290_v54, %v724_v12 }
 0x67b   :  { %v729_v19 = vsel %vm728_vm7, %v1290_v54, %v725_v17 }
 0x67c   :  { %v734_v23 = vsel %vm731_vm8, %v733_v18, %v729_v19 }
 0x67d   :  { %737 = vrot.lane.b32.xlu2 %v734_v23, %s1429_s21  ;;  %476 = vrot.lane.b32.xlu1 %v469_v58, %s1428_s20 }
 0x67e   :  { %739 = vrot.lane.b32.xlu0 %v734_v23, %s1430_s22 }
 0x685   :  { %741 = vrot.lane.b32.xlu2 %v734_v23, %s1428_s20 }
 0x6d7   :  { %v738_v37 = vpop.permute.xlu2 %737 }
 0x6d8   :  { %v744_v41 = vmul.f32 %v1294_v38, %v738_v37 }
 0x6df   :  { %v742_v50 = vpop.permute.xlu2 %741 }
 0x6e7   :  { %v475_v30 = vpop.permute.xlu1 %474  ;;  %v473_v21 = vpop.permute.xlu0 %472 }
 0x6e8   :  { %v478_v32 = vmul.f32 %v475_v30, %v1840_v25  ;;  %v479_v33 = vmul.f32 %v1292_v28, %v473_v21 }
 0x6ea   :  { %v480_v36 = vadd.f32 %v479_v33, %v478_v32 }
 0x6ec   :  { %1295 = vtanh.f32 %v480_v36  ;;  %v1910_v34 = vsel %vm484_vm9, %v480_v36, %v1840_v25 }
 0x6ef   :  { %v477_v45 = vpop.permute.xlu1 %476 }
 0x6f0   :  { %v740_v39 = vpop.permute.xlu0 %739 }
 0x6f1   :  { %v743_v43 = vmul.f32 0.0, %v740_v39 }
 0x6f2   :  { %v1296_v44 = vpop.eup %1295 }
 0x6f3   :  { %v482_v46 = vmul.f32 %v1296_v44, %v477_v45  ;;  %v1912_v48 = vadd.f32 %v744_v41, %v743_v43 }
 0x6f5   :  { %1297 = vtanh.f32 %v1912_v48  ;;  %v1918_v40 = vsel %vm484_vm9, %v482_v46, %v1845_v29  ;;  %v487_v25 = vmul.f32 %v1903_v27, %v482_v46  ;;  %v121_v29 = vpop.f32.mrf.mxu0 }
 0x6f6   :  { %506 = vmatmul.f32.vlgmr.msrb.gmra.mxu0 %v1918_v40  ;;  %v122_v53 = vadd.f32 %v1620_v22, %v121_v29 }
 0x6f7   :  { %677 = vmatmul.f32.gmra.mxu2 %v487_v25  ;;  %924 = vmatpush.msrb.mxu0 %v1729_v61 }
 0x6f9   :  { %925 = vmatpush.msrb.mxu0 %v1731_v62 }
 0x6fb   :  { %v1298_v49 = vpop.eup %1297  ;;  %926 = vmatpush.msrb.mxu0 %v1735_v63 }
 0x6fc   :  { %v1925_v52 = vmul.f32 %v1298_v49, %v742_v50  ;;  %v1956_v49 = vld [vmem:[%s2078_s1 + $0x30] sm:$0xff] }
 0x6fd   :  { %927 = vmatpush.msrb.mxu0 %v1741_v0  ;;  %v1943_v51 = vpop.f32.mrf.mxu0  ;;  %vm543_vm7 = vcmp.ne.f32.partialorder %v1956_v49, 0.0 }
 0x6fe   :  { %1224 = vmatmul.msk.f32.vlgmr.msra.gmra.mxu0 %vm189_vm5, %v1925_v52  ;;  %v125_v7 = vadd.f32 %v1371_v47, %v1943_v51 }
 0x6ff   :  { %928 = vmatpush.msrb.mxu0 %v1747_v1 }
 0x701   :  { %929 = vmatpush.msrb.mxu0 %v1759_v2 }
 0x703   :  { %930 = vmatpush.msrb.mxu0 %v1763_v3 }
 0x705   :  { %931 = vmatpush.msrb.mxu0 %v1769_v4 }
 0x707   :  { %932 = vmatpush.msrb.mxu0 %v1771_v5 }
 0x709   :  { %933 = vmatpush.msrb.mxu0 %v1777_v6 }
 0x70b   :  { %934 = vmatpush.msrb.mxu0 %v1783_v8 }
 0x70d   :  { %935 = vmatpush.msrb.mxu0 %v1789_v9 }
 0x70f   :  { %936 = vmatpush.msrb.mxu0 %v1799_v10 }
 0x711   :  { %937 = vmatpush.msrb.mxu0 %v1804_v11 }
 0x713   :  { %938 = vmatpush.msrb.mxu0 %v1811_v13 }
 0x715   :  { %939 = vmatpush.msrb.mxu0 %v1816_v14 }
 0x773   :  { %v507_v20 = vpop.f32.mrf.mxu0 }
 0x774   :  { %v510_v54 = vadd.f32 %v507_v20, %v122_v53 }
 0x776   :  { %v1221_v55 = vmul.f32 -1.442695, %v510_v54 }
 0x778   :  { %1299 = vpow2.f32 %v1221_v55 }
 0x77b   :  { %v770_v58 = vpop.f32.mrf.mxu0 }
 0x77c   :  { %v773_v59 = vadd.f32 %v770_v58, %v667_v57 }
 0x77e   :  { %v1300_v60 = vpop.eup %1299  ;;  %v1225_v12 = vmul.f32 -1.442695, %v773_v59 }
 0x77f   :  { %v514_v15 = vadd.f32 1.0, %v1300_v60  ;;  %v751_v60 = vsel %vm189_vm5, %v1912_v48, 0.0 }
 0x780   :  { %1301 = vpow2.f32 %v1225_v12 }
 0x781   :  { %1303 = vrcp.f32 %v514_v15  ;;  %v526_v24 = vand.u32 2147483648, %v514_v15  ;;  %v524_v28 = vand.u32 2147483647, %v514_v15  ;;  %vm520_vm11 = vweird.f32 %v514_v15 }
 0x783   :  { %v527_v32 = vor.u32 1.1754944e-38, %v526_v24  ;;  %vm525_vm14 = vcmp.eq.f32.partialorder %v524_v28, 8.507059e+37 }
 0x786   :  { %v1302_v17 = vpop.eup %1301 }
 0x787   :  { %v1304_v18 = vpop.eup %1303  ;;  %v777_v19 = vadd.f32 1.0, %v1302_v17 }
 0x788   :  { %v516_v23 = vmul.f32 %v1304_v18, %v514_v15  ;;  %vm521_vm0 = vweird.f32 %v1304_v18 }
 0x789   :  { %1305 = vrcp.f32 %v777_v19  ;;  %vm522_vm13 = vmor %vm520_vm11, %vm521_vm0  ;;  %v789_v39 = vand.u32 2147483648, %v777_v19  ;;  %v787_v43 = vand.u32 2147483647, %v777_v19  ;;  %vm783_vm2 = vweird.f32 %v777_v19 }
 0x78a   :  { %v517_v22 = vsub.f32 1.0, %v516_v23  ;;  %1307 = vtanh.f32 %v510_v54 }
 0x78b   :  { %v790_v45 = vor.u32 1.1754944e-38, %v789_v39  ;;  %vm788_vm4 = vcmp.eq.f32.partialorder %v787_v43, 8.507059e+37  ;;  %1309 = vtanh.f32 %v773_v59 }
 0x78c   :  { %v518_v26 = vmul.f32 %v1304_v18, %v517_v22 }
 0x78e   :  { %v519_v30 = vadd.f32 %v1304_v18, %v518_v26 }
 0x78f   :  { %v1306_v21 = vpop.eup %1305 }
 0x790   :  { %v523_v33 = vsel %vm522_vm13, %v1304_v18, %v519_v30  ;;  %v779_v36 = vmul.f32 %v1306_v21, %v777_v19  ;;  %vm784_vm1 = vweird.f32 %v1306_v21  ;;  %v1308_v50 = vpop.eup %1307  ;;  %v750_v30 = vsel %vm189_vm5, %v1925_v52, 0.0 }
 0x791   :  { %v528_v37 = vsel %vm525_vm14, %v527_v32, %v523_v33  ;;  %vm785_vm3 = vmor %vm783_vm2, %vm784_vm1  ;;  %v1310_v58 = vpop.eup %1309 }
 0x792   :  { %533 = vrot.lane.b32.xlu1 %v528_v37, %s1430_s22  ;;  %531 = vrot.lane.b32.xlu0 %v528_v37, %s1429_s21  ;;  %v780_v38 = vsub.f32 1.0, %v779_v36 }
 0x794   :  { %v781_v41 = vmul.f32 %v1306_v21, %v780_v38 }
 0x796   :  { %v782_v44 = vadd.f32 %v1306_v21, %v781_v41 }
 0x798   :  { %v786_v46 = vsel %vm785_vm3, %v1306_v21, %v782_v44 }
 0x799   :  { %v791_v25 = vsel %vm788_vm4, %v790_v45, %v786_v46 }
 0x79a   :  { %535 = vrot.lane.b32.xlu1 %v528_v37, %s1428_s20  ;;  %796 = vrot.lane.b32.xlu0 %v791_v25, %s1430_s22 }
 0x79b   :  { %794 = vrot.lane.b32.xlu2 %v791_v25, %s1429_s21 }
 0x7a3   :  { %798 = vrot.lane.b32.xlu2 %v791_v25, %s1428_s20 }
 0x7f5   :  { %v795_v57 = vpop.permute.xlu2 %794 }
 0x7f6   :  { %v801_v15 = vmul.f32 %v1310_v58, %v795_v57 }
 0x7fd   :  { %v799_v26 = vpop.permute.xlu2 %798 }
 0x804   :  { %v534_v29 = vpop.permute.xlu1 %533  ;;  %v532_v53 = vpop.permute.xlu0 %531 }
 0x805   :  { %v537_v20 = vmul.f32 %v534_v29, %v1910_v34  ;;  %v538_v55 = vmul.f32 %v1308_v50, %v532_v53 }
 0x807   :  { %v539_v56 = vadd.f32 %v538_v55, %v537_v20 }
 0x809   :  { %1311 = vtanh.f32 %v539_v56  ;;  %v1963_v54 = vsel %vm543_vm7, %v539_v56, %v1910_v34 }
 0x80c   :  { %v797_v12 = vpop.permute.xlu0 %796  ;;  %v536_v59 = vpop.permute.xlu1 %535 }
 0x80d   :  { %v800_v17 = vmul.f32 %v797_v12, %v751_v60 }
 0x80f   :  { %v1312_v18 = vpop.eup %1311  ;;  %v802_v19 = vadd.f32 %v801_v15, %v800_v17 }
 0x810   :  { %v541_v23 = vmul.f32 %v1312_v18, %v536_v59 }
 0x811   :  { %1313 = vtanh.f32 %v802_v19  ;;  %v1970_v22 = vsel %vm248_vm10, %v802_v19, %v751_v60 }
 0x812   :  { %v544_v34 = vsel %vm543_vm7, %v541_v23, %v1918_v40  ;;  %v546_v24 = vmul.f32 %v1956_v49, %v541_v23 }
 0x813   :  { %565 = vmatmul.f32.vlgmr.msra.gmra.mxu1 %v544_v34 }
 0x814   :  { %680 = vmatmul.f32.gmra.mxu2 %v546_v24  ;;  %981 = vmatpush.msra.mxu1 %v1729_v61 }
 0x816   :  { %982 = vmatpush.msra.mxu1 %v1731_v62 }
 0x817   :  { %v1314_v48 = vpop.eup %1313 }
 0x818   :  { %v804_v28 = vmul.f32 %v1314_v48, %v799_v26  ;;  %983 = vmatpush.msra.mxu1 %v1735_v63  ;;  %v669_v63 = vpop.f32.mrf.mxu2 }
 0x81a   :  { %v807_v40 = vsel %vm248_vm10, %v804_v28, %v750_v30  ;;  %984 = vmatpush.msra.mxu1 %v1741_v0  ;;  %v670_v0 = vadd.f32 %v1883_v35, %v669_v63 }
 0x81b   :  { %826 = vmatmul.f32.vlgmr.msrb.gmra.mxu1 %v807_v40 }
 0x81c   :  { %985 = vmatpush.msra.mxu1 %v1747_v1 }
 0x81e   :  { %986 = vmatpush.msra.mxu1 %v1759_v2 }
 0x820   :  { %987 = vmatpush.msra.mxu1 %v1763_v3  ;;  %v672_v25 = vpop.f32.mrf.mxu2 }
 0x821   :  { %v673_v50 = vadd.f32 %v1883_v35, %v672_v25 }
 0x822   :  { %988 = vmatpush.msra.mxu1 %v1769_v4 }
 0x824   :  { %989 = vmatpush.msra.mxu1 %v1771_v5 }
 0x826   :  { %990 = vmatpush.msra.mxu1 %v1777_v6 }
 0x828   :  { %991 = vmatpush.msra.mxu1 %v1783_v8  ;;  %v675_v63 = vpop.f32.mrf.mxu2 }
 0x82a   :  { %992 = vmatpush.msra.mxu1 %v1789_v9 }
 0x82c   :  { %993 = vmatpush.msra.mxu1 %v1799_v10 }
 0x82e   :  { %994 = vmatpush.msra.mxu1 %v1804_v11 }
 0x830   :  { %995 = vmatpush.msra.mxu1 %v1811_v13 }
 0x832   :  { %996 = vmatpush.msra.mxu1 %v1816_v14 }
 0x890   :  { %v566_v61 = vpop.f32.mrf.mxu1 }
 0x891   :  { %v1998_v62 = vadd.f32 %v566_v61, %v125_v7 }
 0x893   :  { %v1222_v61 = vmul.f32 -1.442695, %v1998_v62 }
 0x898   :  { %v827_v1 = vpop.f32.mrf.mxu1 }
 0x899   :  { %v830_v2 = vadd.f32 %v827_v1, %v670_v0  ;;  %v676_v0 = vadd.f32 %v1883_v35, %v675_v63 }
 0x89b   :  { %v1226_v3 = vmul.f32 -1.442695, %v830_v2 }
 0x89d   :  { %1315 = vpow2.f32 %v1226_v3 }
 0x8a3   :  { %v1316_v4 = vpop.eup %1315 }
 0x8a4   :  { %v834_v5 = vadd.f32 1.0, %v1316_v4 }
 0x8a6   :  { %1317 = vrcp.f32 %v834_v5  ;;  %v846_v10 = vand.u32 2147483648, %v834_v5  ;;  %v844_v13 = vand.u32 2147483647, %v834_v5  ;;  %vm840_vm10 = vweird.f32 %v834_v5 }
 0x8a7   :  { %1319 = vtanh.f32 %v830_v2 }
 0x8a8   :  { %v847_v52 = vor.u32 1.1754944e-38, %v846_v10  ;;  %vm845_vm0 = vcmp.eq.f32.partialorder %v844_v13, 8.507059e+37 }
 0x8ac   :  { %v1318_v6 = vpop.eup %1317 }
 0x8ad   :  { %v836_v8 = vmul.f32 %v1318_v6, %v834_v5  ;;  %vm841_vm5 = vweird.f32 %v1318_v6  ;;  %v1320_v33 = vpop.eup %1319 }
 0x8ae   :  { %vm842_vm8 = vmor %vm840_vm10, %vm841_vm5 }
 0x8af   :  { %v837_v9 = vsub.f32 1.0, %v836_v8 }
 0x8b1   :  { %v838_v11 = vmul.f32 %v1318_v6, %v837_v9 }
 0x8b3   :  { %v839_v14 = vadd.f32 %v1318_v6, %v838_v11 }
 0x8b5   :  { %v843_v51 = vsel %vm842_vm8, %v1318_v6, %v839_v14 }
 0x8b6   :  { %v848_v21 = vsel %vm845_vm0, %v847_v52, %v843_v51 }
 0x8b7   :  { %855 = vrot.lane.b32.xlu2 %v848_v21, %s1428_s20  ;;  %853 = vrot.lane.b32.xlu1 %v848_v21, %s1430_s22 }
 0x8b8   :  { %851 = vrot.lane.b32.xlu0 %v848_v21, %s1429_s21 }
 0x911   :  { %v856_v44 = vpop.permute.xlu2 %855 }
 0x929   :  { %v854_v32 = vpop.permute.xlu1 %853 }
 0x92a   :  { %v857_v36 = vmul.f32 %v854_v32, %v1970_v22  ;;  %v852_v37 = vpop.permute.xlu0 %851 }
 0x92b   :  { %v858_v38 = vmul.f32 %v1320_v33, %v852_v37 }
 0x92d   :  { %v859_v39 = vadd.f32 %v858_v38, %v857_v36 }
 0x92f   :  { %1321 = vtanh.f32 %v859_v39  ;;  %v865_v41 = vsel %vm307_vm15, %v859_v39, %v1970_v22 }
 0x935   :  { %v1322_v43 = vpop.eup %1321 }
 0x936   :  { %v861_v45 = vmul.f32 %v1322_v43, %v856_v44 }
 0x938   :  { %v864_v46 = vsel %vm307_vm15, %v861_v45, %v807_v40 }
 0x939   :  { %883 = vmatmul.f32.vlgmr.msrb.gmra.mxu3 %v864_v46 }
 0x9bc   :  { %v884_v29 = vpop.f32.mrf.mxu3 }
 0x9bd   :  { %v887_v53 = vadd.f32 %v884_v29, %v673_v50 }
 0x9bf   :  { %v1227_v20 = vmul.f32 -1.442695, %v887_v53 }
 0x9c1   :  { %1323 = vpow2.f32 %v1227_v20 }
 0x9c7   :  { %v1324_v55 = vpop.eup %1323 }
 0x9c8   :  { %v891_v56 = vadd.f32 1.0, %v1324_v55 }
 0x9ca   :  { %1325 = vrcp.f32 %v891_v56  ;;  %v903_v12 = vand.u32 2147483648, %v891_v56  ;;  %v901_v17 = vand.u32 2147483647, %v891_v56  ;;  %vm897_vm15 = vweird.f32 %v891_v56 }
 0x9cb   :  { %1327 = vtanh.f32 %v887_v53 }
 0x9cc   :  { %v904_v18 = vor.u32 1.1754944e-38, %v903_v12  ;;  %vm902_vm14 = vcmp.eq.f32.partialorder %v901_v17, 8.507059e+37 }
 0x9d0   :  { %v1326_v57 = vpop.eup %1325 }
 0x9d1   :  { %v893_v58 = vmul.f32 %v1326_v57, %v891_v56  ;;  %vm898_vm11 = vweird.f32 %v1326_v57  ;;  %v1328_v22 = vpop.eup %1327 }
 0x9d2   :  { %vm899_vm13 = vmor %vm897_vm15, %vm898_vm11 }
 0x9d3   :  { %v894_v60 = vsub.f32 1.0, %v893_v58 }
 0x9d5   :  { %v895_v15 = vmul.f32 %v1326_v57, %v894_v60 }
 0x9d7   :  { %v896_v42 = vadd.f32 %v1326_v57, %v895_v15 }
 0x9d9   :  { %v900_v59 = vsel %vm899_vm13, %v1326_v57, %v896_v42 }
 0x9da   :  { %v905_v19 = vsel %vm902_vm14, %v904_v18, %v900_v59 }
 0x9db   :  { %912 = vrot.lane.b32.xlu2 %v905_v19, %s1428_s20  ;;  %910 = vrot.lane.b32.xlu1 %v905_v19, %s1430_s22 }
 0x9dc   :  { %908 = vrot.lane.b32.xlu0 %v905_v19, %s1429_s21 }
 0xa35   :  { %v913_v40 = vpop.permute.xlu2 %912 }
 0xa4d   :  { %v911_v23 = vpop.permute.xlu1 %910 }
 0xa4e   :  { %v914_v34 = vmul.f32 %v911_v23, %v865_v41  ;;  %v909_v24 = vpop.permute.xlu0 %908 }
 0xa4f   :  { %v915_v48 = vmul.f32 %v1328_v22, %v909_v24  ;;  %v2043_v22 = vld [vmem:[%s2078_s1 + $0x38] sm:$0xff]  ;;  %v678_v24 = vpop.f32.mrf.mxu2  ;;  %s1431_s1 = smov [#allocation7]  }
 0xa51   :  { %v916_v26 = vadd.f32 %v915_v48, %v914_v34  ;;  %v679_v48 = vadd.f32 %v1883_v35, %v678_v24 }
 0xa53   :  { %1329 = vtanh.f32 %v916_v26  ;;  %v2016_v28 = vsel %vm366_vm6, %v916_v26, %v865_v41 }
 0xa54   :  { %1331 = vpow2.f32 %v1222_v61 }
 0xa59   :  { %v1330_v30 = vpop.eup %1329 }
 0xa5a   :  { %v918_v47 = vmul.f32 %v1330_v30, %v913_v40  ;;  %v1332_v3 = vpop.eup %1331 }
 0xa5b   :  { %v573_v5 = vadd.f32 1.0, %v1332_v3 }
 0xa5c   :  { %v2020_v7 = vsel %vm366_vm6, %v918_v47, %v864_v46 }
 0xa5d   :  { %940 = vmatmul.f32.vlgmr.msrb.gmra.mxu0 %v2020_v7  ;;  %v585_v41 = vand.u32 2147483648, %v573_v5  ;;  %vm579_vm5 = vweird.f32 %v573_v5  ;;  %v583_v43 = vand.u32 2147483647, %v573_v5 }
 0xa5f   :  { %v586_v45 = vor.u32 1.1754944e-38, %v585_v41  ;;  %vm584_vm8 = vcmp.eq.f32.partialorder %v583_v43, 8.507059e+37 }
 0xada   :  { %v941_v1 = vpop.f32.mrf.mxu0 }
 0xadb   :  { %v944_v2 = vadd.f32 %v941_v1, %v676_v0 }
 0xadd   :  { %v1228_v4 = vmul.f32 -1.442695, %v944_v2 }
 0xadf   :  { %1333 = vpow2.f32 %v1228_v4 }
 0xae0   :  { %1335 = vrcp.f32 %v573_v5 }
 0xae5   :  { %v1334_v6 = vpop.eup %1333 }
 0xae6   :  { %v948_v8 = vadd.f32 1.0, %v1334_v6  ;;  %v1336_v31 = vpop.eup %1335 }
 0xae7   :  { %v575_v9 = vmul.f32 %v1336_v31, %v573_v5  ;;  %vm580_vm4 = vweird.f32 %v1336_v31 }
 0xae8   :  { %1337 = vrcp.f32 %v948_v8  ;;  %v960_v52 = vand.u32 2147483648, %v948_v8  ;;  %v958_v21 = vand.u32 2147483647, %v948_v8  ;;  %vm954_vm1 = vweird.f32 %v948_v8  ;;  %vm581_vm10 = vmor %vm579_vm5, %vm580_vm4 }
 0xae9   :  { %v576_v14 = vsub.f32 1.0, %v575_v9  ;;  %1339 = vtanh.f32 %v944_v2  ;;  %vm1148_vm4 = vcmp.ne.f32.partialorder %v2043_v22, 0.0 }
 0xaea   :  { %v961_v36 = vor.u32 1.1754944e-38, %v960_v52  ;;  %vm959_vm3 = vcmp.eq.f32.partialorder %v958_v21, 8.507059e+37  ;;  %1341 = vtanh.f32 %v1998_v62 }
 0xaeb   :  { %v577_v33 = vmul.f32 %v1336_v31, %v576_v14 }
 0xaed   :  { %v578_v39 = vadd.f32 %v1336_v31, %v577_v33 }
 0xaee   :  { %v1338_v10 = vpop.eup %1337 }
 0xaef   :  { %v950_v11 = vmul.f32 %v1338_v10, %v948_v8  ;;  %vm955_vm6 = vweird.f32 %v1338_v10  ;;  %v582_v44 = vsel %vm581_vm10, %v1336_v31, %v578_v39  ;;  %v1340_v50 = vpop.eup %1339 }
 0xaf0   :  { %vm956_vm2 = vmor %vm954_vm1, %vm955_vm6  ;;  %v587_v46 = vsel %vm584_vm8, %v586_v45, %v582_v44  ;;  %v1342_v58 = vpop.eup %1341 }
 0xaf1   :  { %v951_v13 = vsub.f32 1.0, %v950_v11 }
 0xaf3   :  { %v952_v51 = vmul.f32 %v1338_v10, %v951_v13 }
 0xaf5   :  { %v953_v32 = vadd.f32 %v1338_v10, %v952_v51 }
 0xaf7   :  { %v957_v37 = vsel %vm956_vm2, %v1338_v10, %v953_v32  ;;  %v681_v32 = vpop.f32.mrf.mxu2 }
 0xaf8   :  { %v962_v38 = vsel %vm959_vm3, %v961_v36, %v957_v37  ;;  %v682_v36 = vadd.f32 %v1883_v35, %v681_v32 }
 0xaf9   :  { %969 = vrot.lane.b32.xlu2 %v962_v38, %s1428_s20  ;;  %967 = vrot.lane.b32.xlu1 %v962_v38, %s1430_s22 }
 0xafa   :  { %965 = vrot.lane.b32.xlu0 %v962_v38, %s1429_s21 }
 0xb01   :  { %592 = vrot.lane.b32.xlu1 %v587_v46, %s1430_s22 }
 0xb02   :  { %590 = vrot.lane.b32.xlu0 %v587_v46, %s1429_s21 }
 0xb09   :  { %594 = vrot.lane.b32.xlu1 %v587_v46, %s1428_s20 }
 0xb53   :  { %v970_v42 = vpop.permute.xlu2 %969 }
 0xb6b   :  { %v968_v25 = vpop.permute.xlu1 %967 }
 0xb6c   :  { %v971_v29 = vmul.f32 %v968_v25, %v2016_v28  ;;  %v966_v53 = vpop.permute.xlu0 %965 }
 0xb6d   :  { %v972_v20 = vmul.f32 %v1340_v50, %v966_v53 }
 0xb6f   :  { %v973_v55 = vadd.f32 %v972_v20, %v971_v29 }
 0xb71   :  { %1343 = vtanh.f32 %v973_v55  ;;  %v979_v56 = vsel %vm425_vm12, %v973_v55, %v2016_v28 }
 0xb73   :  { %v593_v57 = vpop.permute.xlu1 %592 }
 0xb74   :  { %v596_v60 = vmul.f32 %v593_v57, %v1963_v54  ;;  %v591_v12 = vpop.permute.xlu0 %590 }
 0xb75   :  { %v597_v15 = vmul.f32 %v1342_v58, %v591_v12 }
 0xb77   :  { %v1344_v17 = vpop.eup %1343  ;;  %v598_v18 = vadd.f32 %v597_v15, %v596_v60 }
 0xb78   :  { %v975_v59 = vmul.f32 %v1344_v17, %v970_v42 }
 0xb79   :  { %1345 = vtanh.f32 %v598_v18 }
 0xb7a   :  { %v978_v62 = vsel %vm425_vm12, %v975_v59, %v2020_v7 }
 0xb7b   :  { %997 = vmatmul.f32.vlgmr.msra.gmra.mxu1 %v978_v62  ;;  %v595_v23 = vpop.permute.xlu1 %594 }
 0xb7f   :  { %v1346_v19 = vpop.eup %1345 }
 0xb80   :  { %v600_v54 = vmul.f32 %v1346_v19, %v595_v23 }
 0xb82   :  { %v602_v34 = vmul.f32 %v2043_v22, %v600_v54 }
 0xb84   :  { %683 = vmatmul.f32.gmra.mxu2 %v602_v34 }
 0xbf8   :  { %v998_v26 = vpop.f32.mrf.mxu1 }
 0xbf9   :  { %v1001_v28 = vadd.f32 %v998_v26, %v679_v48 }
 0xbfb   :  { %v1229_v30 = vmul.f32 -1.442695, %v1001_v28 }
 0xbfd   :  { %1347 = vpow2.f32 %v1229_v30 }
 0xc03   :  { %v1348_v16 = vpop.eup %1347 }
 0xc04   :  { %v1005_v40 = vadd.f32 1.0, %v1348_v16 }
 0xc06   :  { %1349 = vrcp.f32 %v1005_v40  ;;  %v1017_v63 = vand.u32 2147483648, %v1005_v40  ;;  %v1015_v1 = vand.u32 2147483647, %v1005_v40  ;;  %vm1011_vm0 = vweird.f32 %v1005_v40 }
 0xc07   :  { %1351 = vtanh.f32 %v1001_v28  ;;  %v684_v33 = vpop.f32.mrf.mxu2 }
 0xc08   :  { %v1018_v3 = vor.u32 1.1754944e-38, %v1017_v63  ;;  %vm1016_vm15 = vcmp.eq.f32.partialorder %v1015_v1, 8.507059e+37  ;;  %v685_v19 = vadd.f32 %v1883_v35, %v684_v33  ;;  %v1165_v63 = vld [vmem:[#allocation4 + $0x228] sm:$0xff]  ;;  %v1163_v1 = vld [vmem:[#allocation4 + $0x218] sm:$0xff] }
 0xc09   :  { %1168 = vmatpush.msra.mxu0 %v1165_v63 }
 0xc0c   :  { %v1350_v47 = vpop.eup %1349 }
 0xc0d   :  { %v1007_v7 = vmul.f32 %v1350_v47, %v1005_v40  ;;  %vm1012_vm12 = vweird.f32 %v1350_v47  ;;  %v1352_v8 = vpop.eup %1351 }
 0xc0e   :  { %vm1013_vm11 = vmor %vm1011_vm0, %vm1012_vm12 }
 0xc0f   :  { %v1008_v61 = vsub.f32 1.0, %v1007_v7 }
 0xc11   :  { %v1009_v0 = vmul.f32 %v1350_v47, %v1008_v61 }
 0xc13   :  { %v1010_v2 = vadd.f32 %v1350_v47, %v1009_v0  ;;  %v1164_v0 = vld [vmem:[#allocation4 + $0x220] sm:$0xff] }
 0xc14   :  { %1169 = vmatpush.msra.mxu0 %v1164_v0 }
 0xc15   :  { %v1014_v4 = vsel %vm1013_vm11, %v1350_v47, %v1010_v2  ;;  %v1162_v2 = vld [vmem:[#allocation4 + $0x210] sm:$0xff] }
 0xc16   :  { %v1019_v5 = vsel %vm1016_vm15, %v1018_v3, %v1014_v4  ;;  %1170 = vmatpush.msra.mxu0 %v1163_v1  ;;  %v1161_v3 = vld [vmem:[#allocation4 + $0x208] sm:$0xff]  ;;  %v1160_v4 = vld [vmem:[#allocation4 + $0x200] sm:$0xff] }
 0xc17   :  { %1024 = vrot.lane.b32.xlu0 %v1019_v5, %s1430_s22  ;;  %1022 = vrot.lane.b32.xlu2 %v1019_v5, %s1429_s21 }
 0xc18   :  { %1171 = vmatpush.msra.mxu0 %v1162_v2 }
 0xc1a   :  { %1172 = vmatpush.msra.mxu0 %v1161_v3 }
 0xc1c   :  { %1173 = vmatpush.msra.mxu0 %v1160_v4 }
 0xc1f   :  { %1026 = vrot.lane.b32.xlu2 %v1019_v5, %s1428_s20  ;;  %v1159_v5 = vld [vmem:[#allocation4 + $0x1f8] sm:$0xff] }
 0xc20   :  { %1174 = vmatpush.msra.mxu0 %v1159_v5 }
 0xc71   :  { %v1023_v6 = vpop.permute.xlu2 %1022 }
 0xc72   :  { %v1029_v9 = vmul.f32 %v1352_v8, %v1023_v6  ;;  %v1158_v6 = vld [vmem:[#allocation4 + $0x1f0] sm:$0xff]  ;;  %v1157_v8 = vld [vmem:[#allocation4 + $0x1e8] sm:$0xff] }
 0xc73   :  { %1175 = vmatpush.msra.mxu0 %v1158_v6 }
 0xc75   :  { %1176 = vmatpush.msra.mxu0 %v1157_v8 }
 0xc79   :  { %v1027_v52 = vpop.permute.xlu2 %1026 }
 0xc89   :  { %v1025_v31 = vpop.permute.xlu0 %1024 }
 0xc8a   :  { %v1028_v10 = vmul.f32 %v1025_v31, %v979_v56  ;;  %v1156_v31 = vld [vmem:[#allocation4 + $0x1e0] sm:$0xff] }
 0xc8b   :  { %1177 = vmatpush.msra.mxu0 %v1156_v31 }
 0xc8c   :  { %v1030_v11 = vadd.f32 %v1029_v9, %v1028_v10  ;;  %v1155_v9 = vld [vmem:[#allocation4 + $0x1d8] sm:$0xff]  ;;  %v1154_v10 = vld [vmem:[#allocation4 + $0x1d0] sm:$0xff] }
 0xc8d   :  { %1178 = vmatpush.msra.mxu0 %v1155_v9 }
 0xc8e   :  { %1353 = vtanh.f32 %v1030_v11  ;;  %v1036_v13 = vsel %vm484_vm9, %v1030_v11, %v979_v56  ;;  %v1153_v11 = vld [vmem:[#allocation4 + $0x1c8] sm:$0xff] }
 0xc8f   :  { %1179 = vmatpush.msra.mxu0 %v1154_v10 }
 0xc91   :  { %1180 = vmatpush.msra.mxu0 %v1153_v11 }
 0xc94   :  { %v1354_v14 = vpop.eup %1353 }
 0xc95   :  { %v1032_v51 = vmul.f32 %v1354_v14, %v1027_v52  ;;  %v1151_v14 = vld [vmem:[#allocation4 + $0x1b8] sm:$0xff]  ;;  %v1150_v52 = vld [vmem:[#allocation4 + $0x1b0] sm:$0xff] }
 0xc97   :  { %v1035_v21 = vsel %vm484_vm9, %v1032_v51, %v978_v62 }
 0xc98   :  { %1054 = vmatmul.f32.vlgmr.msrb.gmra.mxu2 %v1035_v21 }
 0xd1b   :  { %v1055_v37 = vpop.f32.mrf.mxu2 }
 0xd1c   :  { %v1058_v38 = vadd.f32 %v1055_v37, %v682_v36 }
 0xd1e   :  { %v1230_v39 = vmul.f32 -1.442695, %v1058_v38 }
 0xd20   :  { %1355 = vpow2.f32 %v1230_v39 }
 0xd26   :  { %v1356_v41 = vpop.eup %1355 }
 0xd27   :  { %v1062_v43 = vadd.f32 1.0, %v1356_v41 }
 0xd29   :  { %1357 = vrcp.f32 %v1062_v43  ;;  %v1074_v25 = vand.u32 2147483648, %v1062_v43  ;;  %v1072_v27 = vand.u32 2147483647, %v1062_v43  ;;  %vm1068_vm9 = vweird.f32 %v1062_v43 }
 0xd2a   :  { %1359 = vtanh.f32 %v1058_v38 }
 0xd2b   :  { %v1075_v53 = vor.u32 1.1754944e-38, %v1074_v25  ;;  %vm1073_vm6 = vcmp.eq.f32.partialorder %v1072_v27, 8.507059e+37 }
 0xd2f   :  { %v1358_v44 = vpop.eup %1357 }
 0xd30   :  { %v1064_v45 = vmul.f32 %v1358_v44, %v1062_v43  ;;  %vm1069_vm13 = vweird.f32 %v1358_v44  ;;  %v1360_v57 = vpop.eup %1359 }
 0xd31   :  { %vm1070_vm14 = vmor %vm1068_vm9, %vm1069_vm13 }
 0xd32   :  { %v1065_v46 = vsub.f32 1.0, %v1064_v45 }
 0xd34   :  { %v1066_v50 = vmul.f32 %v1358_v44, %v1065_v46 }
 0xd36   :  { %v1067_v29 = vadd.f32 %v1358_v44, %v1066_v50 }
 0xd38   :  { %v1071_v20 = vsel %vm1070_vm14, %v1358_v44, %v1067_v29  ;;  %v1242_v44 = vld [vmem:[#allocation4 + $0x230] ss:$0 sm:$0xff] }
 0xd39   :  { %v1076_v55 = vsel %vm1073_vm6, %v1075_v53, %v1071_v20 }
 0xd3a   :  { %1083 = vrot.lane.b32.xlu2 %v1076_v55, %s1428_s20  ;;  %1081 = vrot.lane.b32.xlu1 %v1076_v55, %s1430_s22 }
 0xd3b   :  { %1079 = vrot.lane.b32.xlu0 %v1076_v55, %s1429_s21 }
 0xd94   :  { %v1084_v18 = vpop.permute.xlu2 %1083 }
 0xdac   :  { %v1082_v56 = vpop.permute.xlu1 %1081 }
 0xdad   :  { %v1085_v58 = vmul.f32 %v1082_v56, %v1036_v13  ;;  %v1080_v60 = vpop.permute.xlu0 %1079 }
 0xdae   :  { %v1086_v12 = vmul.f32 %v1360_v57, %v1080_v60 }
 0xdb0   :  { %v1087_v15 = vadd.f32 %v1086_v12, %v1085_v58 }
 0xdb2   :  { %1361 = vtanh.f32 %v1087_v15  ;;  %v2060_v17 = vsel %vm543_vm7, %v1087_v15, %v1036_v13  ;;  %v1152_v13 = vld [vmem:[#allocation4 + $0x1c0] sm:$0xff] }
 0xdb3   :  { %1181 = vmatpush.msra.mxu0 %v1152_v13 }
 0xdb5   :  { %1182 = vmatpush.msra.mxu0 %v1151_v14 }
 0xdb7   :  { %1183 = vmatpush.msra.mxu0 %v1150_v52 }
 0xdb8   :  { %v1362_v42 = vpop.eup %1361 }
 0xdb9   :  { %v1089_v59 = vmul.f32 %v1362_v42, %v1084_v18 }
 0xdbb   :  { %v2064_v62 = vsel %vm543_vm7, %v1089_v59, %v1035_v21 }
 0xdbc   :  { %1111 = vmatmul.f32.vlgmr.msra.gmra.mxu3 %v2064_v62 }
 0xe3f   :  { %v1112_v23 = vpop.f32.mrf.mxu3 }
 0xe40   :  { %v1115_v54 = vadd.f32 %v1112_v23, %v685_v19 }
 0xe42   :  { %v1231_v34 = vmul.f32 -1.442695, %v1115_v54 }
 0xe44   :  { %1363 = vpow2.f32 %v1231_v34 }
 0xe4a   :  { %v1364_v24 = vpop.eup %1363 }
 0xe4b   :  { %v1119_v48 = vadd.f32 1.0, %v1364_v24 }
 0xe4d   :  { %1365 = vrcp.f32 %v1119_v48  ;;  %v1131_v16 = vand.u32 2147483648, %v1119_v48  ;;  %v1129_v49 = vand.u32 2147483647, %v1119_v48  ;;  %vm1125_vm7 = vweird.f32 %v1119_v48 }
 0xe4e   :  { %1367 = vtanh.f32 %v1115_v54 }
 0xe4f   :  { %v1132_v7 = vor.u32 1.1754944e-38, %v1131_v16  ;;  %vm1130_vm3 = vcmp.eq.f32.partialorder %v1129_v49, 8.507059e+37 }
 0xe53   :  { %v1366_v26 = vpop.eup %1365 }
 0xe54   :  { %v1121_v28 = vmul.f32 %v1366_v26, %v1119_v48  ;;  %vm1126_vm1 = vweird.f32 %v1366_v26  ;;  %v1368_v21 = vpop.eup %1367 }
 0xe55   :  { %vm1127_vm2 = vmor %vm1125_vm7, %vm1126_vm1 }
 0xe56   :  { %v1122_v30 = vsub.f32 1.0, %v1121_v28 }
 0xe58   :  { %v1123_v40 = vmul.f32 %v1366_v26, %v1122_v30 }
 0xe5a   :  { %v1124_v47 = vadd.f32 %v1366_v26, %v1123_v40 }
 0xe5c   :  { %v1128_v61 = vsel %vm1127_vm2, %v1366_v26, %v1124_v47 }
 0xe5d   :  { %v1133_v35 = vsel %vm1130_vm3, %v1132_v7, %v1128_v61 }
 0xe5e   :  { %1140 = vrot.lane.b32.xlu2 %v1133_v35, %s1428_s20  ;;  %1138 = vrot.lane.b32.xlu1 %v1133_v35, %s1430_s22  ;;  %s1194_s20 = sshll.u32 %s1431_s1, 4  ;;  %s1195_s20 = int_to_ptr.vmem [resolvable:$true] %s1194_s20 }
 0xe5f   :  { %1136 = vrot.lane.b32.xlu0 %v1133_v35, %s1429_s21 }
 0xeb8   :  { %v1141_v39 = vpop.permute.xlu2 %1140 }
 0xed0   :  { %v1139_v51 = vpop.permute.xlu1 %1138 }
 0xed1   :  { %v1142_v32 = vmul.f32 %v1139_v51, %v2060_v17  ;;  %v1137_v33 = vpop.permute.xlu0 %1136 }
 0xed2   :  { %v1143_v36 = vmul.f32 %v1368_v21, %v1137_v33 }
 0xed4   :  { %v1144_v37 = vadd.f32 %v1143_v36, %v1142_v32 }
 0xed6   :  { %1369 = vtanh.f32 %v1144_v37 }
 0xedc   :  { %v1370_v38 = vpop.eup %1369 }
 0xedd   :  { %v1146_v41 = vmul.f32 %v1370_v38, %v1141_v39 }
 0xedf   :  { %v1149_v43 = vsel %vm1148_vm4, %v1146_v41, %v2064_v62 }
 0xee0   :  { %1184 = vmatmul.f32.vlgmr.msra.gmra.mxu0 %v1149_v43 }
 0xf5d   :  { %v1185_v45 = vpop.f32.mrf.mxu0 }
 0xf5e   :  { %v1186_v46 = vadd.f32 %v1242_v44, %v1185_v45 }
 0xf60   :  { %1188 = vst [vmem:[#allocation7] sm:$0xff] %v1186_v46 }
 0xf61   :  { %1199 = dma.vmem_to_hbm [thread:$0]  %s1195_s20, 128, %s1197_s27, [#allocation6]  }
 0xf62   :  { %1422 = dma.done.wait [#allocation6], 128  }
 0xf63   :  { %1423 = vsyncadd [#allocation6], 4294967168 }
 0xf64   :  { %1204 = vsyncpa [#allocation5], 1 }
 0xf65   :  { %1205 = vsyncpa [#allocation6], 1 }

</bundles_post_ra>
